<compile_context>
chip_gen: v5e
topology: v5e:2x2
jax: 0.10.0
libtpu: 0.0.40
codegen_flags: <defaults>
</compile_context>

<pallas_src>
import functools
import numpy as np
import jax
import jax.numpy as jnp
from jax import lax
from jax.experimental import pallas as pl
from jax.experimental.pallas import tpu as pltpu

NUM_EXPERTS = 3
MU = 0.01
EPS = 1e-6  # torch: ones_like / 1e6


def _fused_kernel(xu_ref, qt_ref, w1_ref, wd_ref, exw_ref, bh_ref, out_ref,
                  *, batch, batch_pad):
    """Single invocation: both critics unrolled in Python.

    xu_ref  : [Bp, Din]        shared input
    qt_ref  : [2, Bp, H]       gathered task queries per critic
    w1_ref  : [2, Din, H]      first backbone layer
    wd_ref  : [2, 4, H, H]     w2, w3, w4, w5
    exw_ref : [2, 12, H, H]    ew1[0..2], ew2[0..2], km[0..2], vm[0..2]
    bh_ref  : [2, 13, H]       b1..b5, w6, b6(bcast), eb1[0..2], eb2[0..2]
    out_ref : [Bp, 4]          q1 | q2 | reg1 | reg2
    """
    f32 = jnp.float32
    E = NUM_EXPERTS
    n_pairs = E * (E - 1) // 2
    x = xu_ref[...]                                            # [Bp, Din]

    # Mask for the cosine-similarity batch mean (padded rows excluded).
    if batch_pad != batch:
        row_ids = lax.broadcasted_iota(jnp.int32, (batch_pad, 1), 0)
        row_mask = (row_ids < batch).astype(f32)
    else:
        row_mask = None

    def lin_relu(h, w, b):
        return jnp.maximum(jnp.dot(h, w, preferred_element_type=f32) + b, 0.0)

    for c in range(2):
        def bias(k, _c=c):
            return bh_ref[_c, k:k + 1, :]                      # [1, H]

        # ---- backbone: 3x (linear + relu) ----
        h = lin_relu(x, w1_ref[c, :, :], bias(0))
        h = lin_relu(h, wd_ref[c, 0, :, :], bias(1))
        h = lin_relu(h, wd_ref[c, 1, :, :], bias(2))           # [Bp, H]

        # ---- MoE experts: unrolled E=3, no zero-padded block-diagonals ----
        keys, vals = [], []
        for e in range(E):
            t = lin_relu(h, exw_ref[c, 0 * E + e, :, :], bias(7 + e))
            t = lin_relu(t, exw_ref[c, 1 * E + e, :, :], bias(10 + e))
            keys.append(jnp.dot(t, exw_ref[c, 2 * E + e, :, :],
                                preferred_element_type=f32))   # [Bp, H]
            vals.append(jnp.dot(t, exw_ref[c, 3 * E + e, :, :],
                                preferred_element_type=f32))   # [Bp, H]

        # ---- cosine similarity of expert values (mean over batch & e<f pairs) ----
        normed = []
        for e in range(E):
            ss = jnp.sum(vals[e] * vals[e], axis=-1, keepdims=True)
            normed.append(vals[e] * lax.rsqrt(jnp.maximum(ss, 1e-24)))
        sim_total = 0.0
        for e in range(E):
            for f in range(e + 1, E):
                prod = normed[e] * normed[f]
                if row_mask is not None:
                    prod = prod * row_mask
                sim_total = sim_total + jnp.sum(prod)
        similarity = sim_total / (batch * n_pairs)

        # ---- softmax attention over experts with the gathered task query ----
        q = qt_ref[c, :, :]                                    # [Bp, H]
        scores = [jnp.sum(keys[e] * q, axis=-1, keepdims=True) for e in range(E)]
        m = scores[0]
        for e in range(1, E):
            m = jnp.maximum(m, scores[e])
        exps = [jnp.exp(s - m) for s in scores]
        denom = exps[0]
        for e in range(1, E):
            denom = denom + exps[e]
        attn = [ex / denom for ex in exps]                     # exact (torch parity)

        tower = attn[0] * vals[0]
        log_sum = jnp.log(attn[0] + EPS)
        for e in range(1, E):
            tower = tower + attn[e] * vals[e]                  # [Bp, H]
            log_sum = log_sum + jnp.log(attn[e] + EPS)
        reg = -(1.0 / E) * MU * log_sum + MU * jnp.abs(similarity)  # [Bp, 1]
        # TODO(synk): MoELayer.forward also appends attention weights to
        # self.expert_usage (tensorboard bookkeeping) — stateful side effect,
        # not part of the numerical output, intentionally omitted.

        # ---- tower head: 2x (linear + relu) + final Linear(H, 1) ----
        h2 = lin_relu(tower, wd_ref[c, 2, :, :], bias(3))
        h2 = lin_relu(h2, wd_ref[c, 3, :, :], bias(4))
        w6 = bh_ref[c, 5:6, :]                                 # [1, H]
        b6 = bh_ref[c, 6:7, 0:1]                               # [1, 1]
        qv = jnp.sum(h2 * w6, axis=-1, keepdims=True) + b6     # [Bp, 1]

        out_ref[:, c:c + 1] = qv
        out_ref[:, 2 + c:3 + c] = reg


# ----------------------------- parameter packing -----------------------------

def _pack_critic(p):
    H = p["w2"].shape[0]
    w1 = p["w1"]                                                      # [Din, H]
    wd = jnp.stack([p["w2"], p["w3"], p["w4"], p["w5"]], axis=0)      # [4, H, H]
    exw = jnp.concatenate([p["ew1"], p["ew2"], p["km"], p["vm"]],
                          axis=0)                                     # [12, H, H]
    bh = jnp.stack([p["b1"][0], p["b2"][0], p["b3"][0], p["b4"][0], p["b5"][0],
                    p["w6"][0], jnp.broadcast_to(p["b6"].reshape(()), (H,)),
                    p["eb1"][0], p["eb1"][1], p["eb1"][2],
                    p["eb2"][0], p["eb2"][1], p["eb2"][2]], axis=0)   # [13, H]
    return w1, wd, exw, bh


# --------------------------------- wrapper -----------------------------------

def format_obs(obs, num_tasks):
    # utils.format_obs: obs = [features | one-hot task id] -> (features, task idx)
    feat = obs[:, : obs.shape[1] - num_tasks]
    task = jnp.argmax(obs[:, obs.shape[1] - num_tasks:], axis=1)
    return feat, task


def debug_q_forward(params, obs, action, num_tasks):
    feat, task = format_obs(obs, num_tasks)
    xu = jnp.concatenate([feat, action], axis=1).astype(jnp.float32)
    B, Din = xu.shape
    B_pad = -(-B // 8) * 8                       # fill f32 sublane tile

    qt = jnp.stack([params["critic1"]["task_queries"][task],
                    params["critic2"]["task_queries"][task]], axis=0)  # [2,B,H]
    if B_pad != B:
        xu = jnp.pad(xu, ((0, B_pad - B), (0, 0)))
        qt = jnp.pad(qt, ((0, 0), (0, B_pad - B), (0, 0)))

    pk1 = _pack_critic(params["critic1"])
    pk2 = _pack_critic(params["critic2"])
    w1, wd, exw, bh = (jnp.stack([a, b], axis=0) for a, b in zip(pk1, pk2))

    # Explicit scoped-VMEM limit sized from the packed inputs + headroom.
    io_bytes = sum(int(a.size) * a.dtype.itemsize
                   for a in (xu, qt, w1, wd, exw, bh)) + B_pad * 4 * 4
    vmem_limit = int(min(64 << 20, max(16 << 20, 2 * io_bytes + (4 << 20))))

    kernel = functools.partial(_fused_kernel, batch=B, batch_pad=B_pad)
    out = pl.pallas_call(
        kernel,
        out_shape=jax.ShapeDtypeStruct((B_pad, 4), jnp.float32),
        compiler_params=pltpu.CompilerParams(vmem_limit_bytes=vmem_limit),
    )(xu, qt, w1, wd, exw, bh)

    q1 = out[:B, 0:1]
    q2 = out[:B, 1:2]
    reg = out[:B, 2] + out[:B, 3]
    return q1, q2, reg


# ------------------------------ initialization --------------------------------

def init_params(key, obs_size, action_size, hidden_dim, num_tasks):
    d_in = obs_size - num_tasks + action_size
    H = hidden_dim
    keys = list(jax.random.split(key, 64))
    ki = iter(keys)

    def xavier(shape):
        fan_in, fan_out = shape[-2], shape[-1]
        a = float(np.sqrt(6.0 / (fan_in + fan_out)))
        return jax.random.uniform(next(ki), shape, jnp.float32, -a, a)

    def critic_params():
        p = {}
        p["w1"] = xavier((d_in, H)); p["b1"] = jnp.zeros((1, H), jnp.float32)
        for wn, bn in (("w2", "b2"), ("w3", "b3"), ("w4", "b4"), ("w5", "b5")):
            p[wn] = xavier((H, H)); p[bn] = jnp.zeros((1, H), jnp.float32)
        a6 = float(np.sqrt(6.0 / (H + 1)))
        p["w6"] = jax.random.uniform(next(ki), (1, H), jnp.float32, -a6, a6)
        p["b6"] = jnp.zeros((1, 1), jnp.float32)
        # MoE expert MLPs: Linear(H,H)-ReLU-Linear(H,H)-ReLU per expert
        p["ew1"] = xavier((NUM_EXPERTS, H, H))
        p["eb1"] = jnp.zeros((NUM_EXPERTS, H), jnp.float32)
        p["ew2"] = xavier((NUM_EXPERTS, H, H))
        p["eb2"] = jnp.zeros((NUM_EXPERTS, H), jnp.float32)
        # key/value matrices & task queries ~ N(0, 1) (torch.randn Parameters)
        p["km"] = jax.random.normal(next(ki), (NUM_EXPERTS, H, H), jnp.float32)
        p["vm"] = jax.random.normal(next(ki), (NUM_EXPERTS, H, H), jnp.float32)
        p["task_queries"] = jax.random.normal(next(ki), (num_tasks, H),
                                              jnp.float32)
        return p

    return {"critic1": critic_params(), "critic2": critic_params()}


# ------------------------------ pure-JAX reference ----------------------------

def _ref_forward(params, obs, action, num_tasks):
    hp = jax.lax.Precision.HIGHEST
    mm = lambda a, b: jnp.dot(a, b, precision=hp)
    relu = jax.nn.relu
    feat, task = format_obs(obs, num_tasks)
    xu = jnp.concatenate([feat, action], axis=1).astype(jnp.float32)
    E = NUM_EXPERTS

    def critic(p):
        h = relu(mm(xu, p["w1"]) + p["b1"])
        h = relu(mm(h, p["w2"]) + p["b2"])
        h = relu(mm(h, p["w3"]) + p["b3"])
        outs = []
        for e in range(E):
            t = relu(mm(h, p["ew1"][e]) + p["eb1"][e])
            t = relu(mm(t, p["ew2"][e]) + p["eb2"][e])
            outs.append(t)
        keys = jnp.stack([mm(outs[e], p["km"][e]) for e in range(E)], axis=1)
        vals = jnp.stack([mm(outs[e], p["vm"][e]) for e in range(E)], axis=1)
        normed = vals / jnp.maximum(
            jnp.linalg.norm(vals, axis=-1, keepdims=True), 1e-12)
        sim = jnp.einsum("beh,bfh->bef", normed, normed, precision=hp)
        pairs = [(e, f) for e in range(E) for f in range(e + 1, E)]
        similarity = jnp.mean(jnp.stack([sim[:, e, f] for e, f in pairs], axis=1))
        q = p["task_queries"][task]
        scores = jnp.einsum("beh,bh->be", keys, q, precision=hp)
        attn = jax.nn.softmax(scores, axis=-1)
        tower = jnp.einsum("be,beh->bh", attn, vals, precision=hp)
        reg = (-(1.0 / E) * MU * jnp.sum(jnp.log(attn + EPS), axis=-1)
               + MU * jnp.abs(similarity))
        h2 = relu(mm(tower, p["w4"]) + p["b4"])
        h2 = relu(mm(h2, p["w5"]) + p["b5"])
        qv = mm(h2, p["w6"].T) + p["b6"]
        return qv, reg

    q1, r1 = critic(params["critic1"])
    q2, r2 = critic(params["critic2"])
    return q1, q2, r1 + r2


if __name__ == "__main__":
    B, obs_size, action_size, hidden_dim, num_tasks = 2, 22, 4, 32, 10
    key = jax.random.PRNGKey(0)
    pkey, okey, akey, tkey = jax.random.split(key, 4)

    params = init_params(pkey, obs_size, action_size, hidden_dim, num_tasks)

    feat = jax.random.normal(okey, (B, obs_size - num_tasks), jnp.float32)
    task_ids = jax.random.randint(tkey, (B,), 0, num_tasks)
    one_hot = jax.nn.one_hot(task_ids, num_tasks, dtype=jnp.float32)
    obs = jnp.concatenate([feat, one_hot], axis=1)       # [B, obs_size]
    action = jax.random.normal(akey, (B, action_size), jnp.float32)

    q1, q2, reg = debug_q_forward(params, obs, action, num_tasks)
    jax.block_until_ready((q1, q2, reg))
    assert q1.shape == (B, 1) and q2.shape == (B, 1) and reg.shape == (B,)
    assert bool(jnp.all(jnp.isfinite(q1))) and bool(jnp.all(jnp.isfinite(reg)))

    rq1, rq2, rreg = _ref_forward(params, obs, action, num_tasks)
    np.testing.assert_allclose(np.asarray(q1), np.asarray(rq1), rtol=2e-3, atol=2e-3)
    np.testing.assert_allclose(np.asarray(q2), np.asarray(rq2), rtol=2e-3, atol=2e-3)
    np.testing.assert_allclose(np.asarray(reg), np.asarray(rreg), rtol=2e-3, atol=2e-3)
    print("KERNEL_OK")
</pallas_src>

<mosaic_0001>
module attributes {stable_mosaic.version = 11 : i64} {
  func.func @_fused_kernel(%arg0: memref<8x16xf32, #tpu.memory_space<vmem>>, %arg1: memref<2x8x32xf32, #tpu.memory_space<vmem>>, %arg2: memref<2x16x32xf32, #tpu.memory_space<vmem>>, %arg3: memref<2x4x32x32xf32, #tpu.memory_space<vmem>>, %arg4: memref<2x12x32x32xf32, #tpu.memory_space<vmem>>, %arg5: memref<2x13x32xf32, #tpu.memory_space<vmem>>, %arg6: memref<8x4xf32, #tpu.memory_space<vmem>>) attributes {dimension_semantics = [], scalar_prefetch = 0 : i64, scratch_operands = 0 : i64, tpu.core_type = #tpu.core_type<tc>} {
    %c0 = arith.constant 0 : index
    %c0_0 = arith.constant 0 : index
    %0 = vector.load %arg0[%c0, %c0_0] : memref<8x16xf32, #tpu.memory_space<vmem>>, vector<8x16xf32>
    %1 = tpu.iota {dimensions = array<i32: 0>} : vector<8x1xi32>
    %c2_i32 = arith.constant 2 : i32
    %2 = vector.broadcast %c2_i32 : i32 to vector<8x1xi32>
    %3 = arith.cmpi slt, %1, %2 : vector<8x1xi32>
    %4 = arith.extui %3 : vector<8x1xi1> to vector<8x1xi32>
    %5 = arith.sitofp %4 : vector<8x1xi32> to vector<8x1xf32>
    %c0_1 = arith.constant 0 : index
    %c0_2 = arith.constant 0 : index
    %c0_3 = arith.constant 0 : index
    %6 = vector.load %arg2[%c0_1, %c0_2, %c0_3] : memref<2x16x32xf32, #tpu.memory_space<vmem>>, vector<1x16x32xf32>
    %7 = vector.shape_cast %6 : vector<1x16x32xf32> to vector<16x32xf32>
    %c0_4 = arith.constant 0 : index
    %c0_5 = arith.constant 0 : index
    %c0_6 = arith.constant 0 : index
    %8 = vector.load %arg5[%c0_4, %c0_5, %c0_6] : memref<2x13x32xf32, #tpu.memory_space<vmem>>, vector<1x1x32xf32>
    %9 = vector.shape_cast %8 : vector<1x1x32xf32> to vector<1x32xf32>
    %cst = arith.constant dense<0.000000e+00> : vector<8x32xf32>
    %10 = tpu.matmul %0, %7, %cst {dimension_numbers = #tpu.dot_dimension_numbers<[1], [0], [0], [1], [0, 0, 1, 1], [], []>} : vector<8x16xf32>, vector<16x32xf32>, vector<8x32xf32> -> vector<8x32xf32>
    %11 = vector.broadcast %9 : vector<1x32xf32> to vector<8x32xf32>
    %12 = arith.addf %10, %11 : vector<8x32xf32>
    %cst_7 = arith.constant 0.000000e+00 : f32
    %13 = vector.broadcast %cst_7 : f32 to vector<8x32xf32>
    %14 = arith.maximumf %12, %13 : vector<8x32xf32>
    %c0_8 = arith.constant 0 : index
    %c0_9 = arith.constant 0 : index
    %c0_10 = arith.constant 0 : index
    %c0_11 = arith.constant 0 : index
    %15 = vector.load %arg3[%c0_8, %c0_9, %c0_10, %c0_11] : memref<2x4x32x32xf32, #tpu.memory_space<vmem>>, vector<1x1x32x32xf32>
    %16 = vector.shape_cast %15 : vector<1x1x32x32xf32> to vector<32x32xf32>
    %c0_12 = arith.constant 0 : index
    %c1 = arith.constant 1 : index
    %c0_13 = arith.constant 0 : index
    %17 = vector.load %arg5[%c0_12, %c1, %c0_13] : memref<2x13x32xf32, #tpu.memory_space<vmem>>, vector<1x1x32xf32>
    %18 = vector.shape_cast %17 : vector<1x1x32xf32> to vector<1x32xf32>
    %cst_14 = arith.constant dense<0.000000e+00> : vector<8x32xf32>
    %19 = tpu.matmul %14, %16, %cst_14 {dimension_numbers = #tpu.dot_dimension_numbers<[1], [0], [0], [1], [0, 0, 1, 1], [], []>} : vector<8x32xf32>, vector<32x32xf32>, vector<8x32xf32> -> vector<8x32xf32>
    %20 = vector.broadcast %18 : vector<1x32xf32> to vector<8x32xf32>
    %21 = arith.addf %19, %20 : vector<8x32xf32>
    %cst_15 = arith.constant 0.000000e+00 : f32
    %22 = vector.broadcast %cst_15 : f32 to vector<8x32xf32>
    %23 = arith.maximumf %21, %22 : vector<8x32xf32>
    %c0_16 = arith.constant 0 : index
    %c1_17 = arith.constant 1 : index
    %c0_18 = arith.constant 0 : index
    %c0_19 = arith.constant 0 : index
    %24 = vector.load %arg3[%c0_16, %c1_17, %c0_18, %c0_19] : memref<2x4x32x32xf32, #tpu.memory_space<vmem>>, vector<1x1x32x32xf32>
    %25 = vector.shape_cast %24 : vector<1x1x32x32xf32> to vector<32x32xf32>
    %c0_20 = arith.constant 0 : index
    %c2 = arith.constant 2 : index
    %c0_21 = arith.constant 0 : index
    %26 = vector.load %arg5[%c0_20, %c2, %c0_21] : memref<2x13x32xf32, #tpu.memory_space<vmem>>, vector<1x1x32xf32>
    %27 = vector.shape_cast %26 : vector<1x1x32xf32> to vector<1x32xf32>
    %cst_22 = arith.constant dense<0.000000e+00> : vector<8x32xf32>
    %28 = tpu.matmul %23, %25, %cst_22 {dimension_numbers = #tpu.dot_dimension_numbers<[1], [0], [0], [1], [0, 0, 1, 1], [], []>} : vector<8x32xf32>, vector<32x32xf32>, vector<8x32xf32> -> vector<8x32xf32>
    %29 = vector.broadcast %27 : vector<1x32xf32> to vector<8x32xf32>
    %30 = arith.addf %28, %29 : vector<8x32xf32>
    %cst_23 = arith.constant 0.000000e+00 : f32
    %31 = vector.broadcast %cst_23 : f32 to vector<8x32xf32>
    %32 = arith.maximumf %30, %31 : vector<8x32xf32>
    %c0_24 = arith.constant 0 : index
    %c0_25 = arith.constant 0 : index
    %c0_26 = arith.constant 0 : index
    %c0_27 = arith.constant 0 : index
    %33 = vector.load %arg4[%c0_24, %c0_25, %c0_26, %c0_27] : memref<2x12x32x32xf32, #tpu.memory_space<vmem>>, vector<1x1x32x32xf32>
    %34 = vector.shape_cast %33 : vector<1x1x32x32xf32> to vector<32x32xf32>
    %c0_28 = arith.constant 0 : index
    %c7 = arith.constant 7 : index
    %c0_29 = arith.constant 0 : index
    %35 = vector.load %arg5[%c0_28, %c7, %c0_29] : memref<2x13x32xf32, #tpu.memory_space<vmem>>, vector<1x1x32xf32>
    %36 = vector.shape_cast %35 : vector<1x1x32xf32> to vector<1x32xf32>
    %cst_30 = arith.constant dense<0.000000e+00> : vector<8x32xf32>
    %37 = tpu.matmul %32, %34, %cst_30 {dimension_numbers = #tpu.dot_dimension_numbers<[1], [0], [0], [1], [0, 0, 1, 1], [], []>} : vector<8x32xf32>, vector<32x32xf32>, vector<8x32xf32> -> vector<8x32xf32>
    %38 = vector.broadcast %36 : vector<1x32xf32> to vector<8x32xf32>
    %39 = arith.addf %37, %38 : vector<8x32xf32>
    %cst_31 = arith.constant 0.000000e+00 : f32
    %40 = vector.broadcast %cst_31 : f32 to vector<8x32xf32>
    %41 = arith.maximumf %39, %40 : vector<8x32xf32>
    %c0_32 = arith.constant 0 : index
    %c3 = arith.constant 3 : index
    %c0_33 = arith.constant 0 : index
    %c0_34 = arith.constant 0 : index
    %42 = vector.load %arg4[%c0_32, %c3, %c0_33, %c0_34] : memref<2x12x32x32xf32, #tpu.memory_space<vmem>>, vector<1x1x32x32xf32>
    %43 = vector.shape_cast %42 : vector<1x1x32x32xf32> to vector<32x32xf32>
    %c0_35 = arith.constant 0 : index
    %c10 = arith.constant 10 : index
    %c0_36 = arith.constant 0 : index
    %44 = vector.load %arg5[%c0_35, %c10, %c0_36] : memref<2x13x32xf32, #tpu.memory_space<vmem>>, vector<1x1x32xf32>
    %45 = vector.shape_cast %44 : vector<1x1x32xf32> to vector<1x32xf32>
    %cst_37 = arith.constant dense<0.000000e+00> : vector<8x32xf32>
    %46 = tpu.matmul %41, %43, %cst_37 {dimension_numbers = #tpu.dot_dimension_numbers<[1], [0], [0], [1], [0, 0, 1, 1], [], []>} : vector<8x32xf32>, vector<32x32xf32>, vector<8x32xf32> -> vector<8x32xf32>
    %47 = vector.broadcast %45 : vector<1x32xf32> to vector<8x32xf32>
    %48 = arith.addf %46, %47 : vector<8x32xf32>
    %cst_38 = arith.constant 0.000000e+00 : f32
    %49 = vector.broadcast %cst_38 : f32 to vector<8x32xf32>
    %50 = arith.maximumf %48, %49 : vector<8x32xf32>
    %c0_39 = arith.constant 0 : index
    %c6 = arith.constant 6 : index
    %c0_40 = arith.constant 0 : index
    %c0_41 = arith.constant 0 : index
    %51 = vector.load %arg4[%c0_39, %c6, %c0_40, %c0_41] : memref<2x12x32x32xf32, #tpu.memory_space<vmem>>, vector<1x1x32x32xf32>
    %52 = vector.shape_cast %51 : vector<1x1x32x32xf32> to vector<32x32xf32>
    %cst_42 = arith.constant dense<0.000000e+00> : vector<8x32xf32>
    %53 = tpu.matmul %50, %52, %cst_42 {dimension_numbers = #tpu.dot_dimension_numbers<[1], [0], [0], [1], [0, 0, 1, 1], [], []>} : vector<8x32xf32>, vector<32x32xf32>, vector<8x32xf32> -> vector<8x32xf32>
    %c0_43 = arith.constant 0 : index
    %c9 = arith.constant 9 : index
    %c0_44 = arith.constant 0 : index
    %c0_45 = arith.constant 0 : index
    %54 = vector.load %arg4[%c0_43, %c9, %c0_44, %c0_45] : memref<2x12x32x32xf32, #tpu.memory_space<vmem>>, vector<1x1x32x32xf32>
    %55 = vector.shape_cast %54 : vector<1x1x32x32xf32> to vector<32x32xf32>
    %cst_46 = arith.constant dense<0.000000e+00> : vector<8x32xf32>
    %56 = tpu.matmul %50, %55, %cst_46 {dimension_numbers = #tpu.dot_dimension_numbers<[1], [0], [0], [1], [0, 0, 1, 1], [], []>} : vector<8x32xf32>, vector<32x32xf32>, vector<8x32xf32> -> vector<8x32xf32>
    %c0_47 = arith.constant 0 : index
    %c1_48 = arith.constant 1 : index
    %c0_49 = arith.constant 0 : index
    %c0_50 = arith.constant 0 : index
    %57 = vector.load %arg4[%c0_47, %c1_48, %c0_49, %c0_50] : memref<2x12x32x32xf32, #tpu.memory_space<vmem>>, vector<1x1x32x32xf32>
    %58 = vector.shape_cast %57 : vector<1x1x32x32xf32> to vector<32x32xf32>
    %c0_51 = arith.constant 0 : index
    %c8 = arith.constant 8 : index
    %c0_52 = arith.constant 0 : index
    %59 = vector.load %arg5[%c0_51, %c8, %c0_52] : memref<2x13x32xf32, #tpu.memory_space<vmem>>, vector<1x1x32xf32>
    %60 = vector.shape_cast %59 : vector<1x1x32xf32> to vector<1x32xf32>
    %cst_53 = arith.constant dense<0.000000e+00> : vector<8x32xf32>
    %61 = tpu.matmul %32, %58, %cst_53 {dimension_numbers = #tpu.dot_dimension_numbers<[1], [0], [0], [1], [0, 0, 1, 1], [], []>} : vector<8x32xf32>, vector<32x32xf32>, vector<8x32xf32> -> vector<8x32xf32>
    %62 = vector.broadcast %60 : vector<1x32xf32> to vector<8x32xf32>
    %63 = arith.addf %61, %62 : vector<8x32xf32>
    %cst_54 = arith.constant 0.000000e+00 : f32
    %64 = vector.broadcast %cst_54 : f32 to vector<8x32xf32>
    %65 = arith.maximumf %63, %64 : vector<8x32xf32>
    %c0_55 = arith.constant 0 : index
    %c4 = arith.constant 4 : index
    %c0_56 = arith.constant 0 : index
    %c0_57 = arith.constant 0 : index
    %66 = vector.load %arg4[%c0_55, %c4, %c0_56, %c0_57] : memref<2x12x32x32xf32, #tpu.memory_space<vmem>>, vector<1x1x32x32xf32>
    %67 = vector.shape_cast %66 : vector<1x1x32x32xf32> to vector<32x32xf32>
    %c0_58 = arith.constant 0 : index
    %c11 = arith.constant 11 : index
    %c0_59 = arith.constant 0 : index
    %68 = vector.load %arg5[%c0_58, %c11, %c0_59] : memref<2x13x32xf32, #tpu.memory_space<vmem>>, vector<1x1x32xf32>
    %69 = vector.shape_cast %68 : vector<1x1x32xf32> to vector<1x32xf32>
    %cst_60 = arith.constant dense<0.000000e+00> : vector<8x32xf32>
    %70 = tpu.matmul %65, %67, %cst_60 {dimension_numbers = #tpu.dot_dimension_numbers<[1], [0], [0], [1], [0, 0, 1, 1], [], []>} : vector<8x32xf32>, vector<32x32xf32>, vector<8x32xf32> -> vector<8x32xf32>
    %71 = vector.broadcast %69 : vector<1x32xf32> to vector<8x32xf32>
    %72 = arith.addf %70, %71 : vector<8x32xf32>
    %cst_61 = arith.constant 0.000000e+00 : f32
    %73 = vector.broadcast %cst_61 : f32 to vector<8x32xf32>
    %74 = arith.maximumf %72, %73 : vector<8x32xf32>
    %c0_62 = arith.constant 0 : index
    %c7_63 = arith.constant 7 : index
    %c0_64 = arith.constant 0 : index
    %c0_65 = arith.constant 0 : index
    %75 = vector.load %arg4[%c0_62, %c7_63, %c0_64, %c0_65] : memref<2x12x32x32xf32, #tpu.memory_space<vmem>>, vector<1x1x32x32xf32>
    %76 = vector.shape_cast %75 : vector<1x1x32x32xf32> to vector<32x32xf32>
    %cst_66 = arith.constant dense<0.000000e+00> : vector<8x32xf32>
    %77 = tpu.matmul %74, %76, %cst_66 {dimension_numbers = #tpu.dot_dimension_numbers<[1], [0], [0], [1], [0, 0, 1, 1], [], []>} : vector<8x32xf32>, vector<32x32xf32>, vector<8x32xf32> -> vector<8x32xf32>
    %c0_67 = arith.constant 0 : index
    %c10_68 = arith.constant 10 : index
    %c0_69 = arith.constant 0 : index
    %c0_70 = arith.constant 0 : index
    %78 = vector.load %arg4[%c0_67, %c10_68, %c0_69, %c0_70] : memref<2x12x32x32xf32, #tpu.memory_space<vmem>>, vector<1x1x32x32xf32>
    %79 = vector.shape_cast %78 : vector<1x1x32x32xf32> to vector<32x32xf32>
    %cst_71 = arith.constant dense<0.000000e+00> : vector<8x32xf32>
    %80 = tpu.matmul %74, %79, %cst_71 {dimension_numbers = #tpu.dot_dimension_numbers<[1], [0], [0], [1], [0, 0, 1, 1], [], []>} : vector<8x32xf32>, vector<32x32xf32>, vector<8x32xf32> -> vector<8x32xf32>
    %c0_72 = arith.constant 0 : index
    %c2_73 = arith.constant 2 : index
    %c0_74 = arith.constant 0 : index
    %c0_75 = arith.constant 0 : index
    %81 = vector.load %arg4[%c0_72, %c2_73, %c0_74, %c0_75] : memref<2x12x32x32xf32, #tpu.memory_space<vmem>>, vector<1x1x32x32xf32>
    %82 = vector.shape_cast %81 : vector<1x1x32x32xf32> to vector<32x32xf32>
    %c0_76 = arith.constant 0 : index
    %c9_77 = arith.constant 9 : index
    %c0_78 = arith.constant 0 : index
    %83 = vector.load %arg5[%c0_76, %c9_77, %c0_78] : memref<2x13x32xf32, #tpu.memory_space<vmem>>, vector<1x1x32xf32>
    %84 = vector.shape_cast %83 : vector<1x1x32xf32> to vector<1x32xf32>
    %cst_79 = arith.constant dense<0.000000e+00> : vector<8x32xf32>
    %85 = tpu.matmul %32, %82, %cst_79 {dimension_numbers = #tpu.dot_dimension_numbers<[1], [0], [0], [1], [0, 0, 1, 1], [], []>} : vector<8x32xf32>, vector<32x32xf32>, vector<8x32xf32> -> vector<8x32xf32>
    %86 = vector.broadcast %84 : vector<1x32xf32> to vector<8x32xf32>
    %87 = arith.addf %85, %86 : vector<8x32xf32>
    %cst_80 = arith.constant 0.000000e+00 : f32
    %88 = vector.broadcast %cst_80 : f32 to vector<8x32xf32>
    %89 = arith.maximumf %87, %88 : vector<8x32xf32>
    %c0_81 = arith.constant 0 : index
    %c5 = arith.constant 5 : index
    %c0_82 = arith.constant 0 : index
    %c0_83 = arith.constant 0 : index
    %90 = vector.load %arg4[%c0_81, %c5, %c0_82, %c0_83] : memref<2x12x32x32xf32, #tpu.memory_space<vmem>>, vector<1x1x32x32xf32>
    %91 = vector.shape_cast %90 : vector<1x1x32x32xf32> to vector<32x32xf32>
    %c0_84 = arith.constant 0 : index
    %c12 = arith.constant 12 : index
    %c0_85 = arith.constant 0 : index
    %92 = vector.load %arg5[%c0_84, %c12, %c0_85] : memref<2x13x32xf32, #tpu.memory_space<vmem>>, vector<1x1x32xf32>
    %93 = vector.shape_cast %92 : vector<1x1x32xf32> to vector<1x32xf32>
    %cst_86 = arith.constant dense<0.000000e+00> : vector<8x32xf32>
    %94 = tpu.matmul %89, %91, %cst_86 {dimension_numbers = #tpu.dot_dimension_numbers<[1], [0], [0], [1], [0, 0, 1, 1], [], []>} : vector<8x32xf32>, vector<32x32xf32>, vector<8x32xf32> -> vector<8x32xf32>
    %95 = vector.broadcast %93 : vector<1x32xf32> to vector<8x32xf32>
    %96 = arith.addf %94, %95 : vector<8x32xf32>
    %cst_87 = arith.constant 0.000000e+00 : f32
    %97 = vector.broadcast %cst_87 : f32 to vector<8x32xf32>
    %98 = arith.maximumf %96, %97 : vector<8x32xf32>
    %c0_88 = arith.constant 0 : index
    %c8_89 = arith.constant 8 : index
    %c0_90 = arith.constant 0 : index
    %c0_91 = arith.constant 0 : index
    %99 = vector.load %arg4[%c0_88, %c8_89, %c0_90, %c0_91] : memref<2x12x32x32xf32, #tpu.memory_space<vmem>>, vector<1x1x32x32xf32>
    %100 = vector.shape_cast %99 : vector<1x1x32x32xf32> to vector<32x32xf32>
    %cst_92 = arith.constant dense<0.000000e+00> : vector<8x32xf32>
    %101 = tpu.matmul %98, %100, %cst_92 {dimension_numbers = #tpu.dot_dimension_numbers<[1], [0], [0], [1], [0, 0, 1, 1], [], []>} : vector<8x32xf32>, vector<32x32xf32>, vector<8x32xf32> -> vector<8x32xf32>
    %c0_93 = arith.constant 0 : index
    %c11_94 = arith.constant 11 : index
    %c0_95 = arith.constant 0 : index
    %c0_96 = arith.constant 0 : index
    %102 = vector.load %arg4[%c0_93, %c11_94, %c0_95, %c0_96] : memref<2x12x32x32xf32, #tpu.memory_space<vmem>>, vector<1x1x32x32xf32>
    %103 = vector.shape_cast %102 : vector<1x1x32x32xf32> to vector<32x32xf32>
    %cst_97 = arith.constant dense<0.000000e+00> : vector<8x32xf32>
    %104 = tpu.matmul %98, %103, %cst_97 {dimension_numbers = #tpu.dot_dimension_numbers<[1], [0], [0], [1], [0, 0, 1, 1], [], []>} : vector<8x32xf32>, vector<32x32xf32>, vector<8x32xf32> -> vector<8x32xf32>
    %105 = arith.mulf %56, %56 : vector<8x32xf32>
    %cst_98 = arith.constant dense<0.000000e+00> : vector<8xf32>
    %106 = vector.multi_reduction <add>, %105, %cst_98 [1] : vector<8x32xf32> to vector<8xf32>
    %107 = vector.shape_cast %106 : vector<8xf32> to vector<8x1xf32>
    %cst_99 = arith.constant 1.000000e-24 : f32
    %108 = vector.broadcast %cst_99 : f32 to vector<8x1xf32>
    %109 = arith.maximumf %107, %108 : vector<8x1xf32>
    %110 = math.rsqrt %109 : vector<8x1xf32>
    %111 = vector.broadcast %110 : vector<8x1xf32> to vector<8x32xf32>
    %112 = arith.mulf %56, %111 : vector<8x32xf32>
    %113 = arith.mulf %80, %80 : vector<8x32xf32>
    %cst_100 = arith.constant dense<0.000000e+00> : vector<8xf32>
    %114 = vector.multi_reduction <add>, %113, %cst_100 [1] : vector<8x32xf32> to vector<8xf32>
    %115 = vector.shape_cast %114 : vector<8xf32> to vector<8x1xf32>
    %cst_101 = arith.constant 1.000000e-24 : f32
    %116 = vector.broadcast %cst_101 : f32 to vector<8x1xf32>
    %117 = arith.maximumf %115, %116 : vector<8x1xf32>
    %118 = math.rsqrt %117 : vector<8x1xf32>
    %119 = vector.broadcast %118 : vector<8x1xf32> to vector<8x32xf32>
    %120 = arith.mulf %80, %119 : vector<8x32xf32>
    %121 = arith.mulf %104, %104 : vector<8x32xf32>
    %cst_102 = arith.constant dense<0.000000e+00> : vector<8xf32>
    %122 = vector.multi_reduction <add>, %121, %cst_102 [1] : vector<8x32xf32> to vector<8xf32>
    %123 = vector.shape_cast %122 : vector<8xf32> to vector<8x1xf32>
    %cst_103 = arith.constant 1.000000e-24 : f32
    %124 = vector.broadcast %cst_103 : f32 to vector<8x1xf32>
    %125 = arith.maximumf %123, %124 : vector<8x1xf32>
    %126 = math.rsqrt %125 : vector<8x1xf32>
    %127 = vector.broadcast %126 : vector<8x1xf32> to vector<8x32xf32>
    %128 = arith.mulf %104, %127 : vector<8x32xf32>
    %129 = arith.mulf %112, %120 : vector<8x32xf32>
    %130 = vector.broadcast %5 : vector<8x1xf32> to vector<8x32xf32>
    %131 = arith.mulf %129, %130 : vector<8x32xf32>
    %132 = vector.shape_cast %131 : vector<8x32xf32> to vector<1x8x32xf32>
    %cst_104 = arith.constant dense<0.000000e+00> : vector<1xf32>
    %133 = vector.multi_reduction <add>, %132, %cst_104 [1, 2] : vector<1x8x32xf32> to vector<1xf32>
    %134 = vector.shape_cast %133 : vector<1xf32> to vector<1x1x1xf32>
    %135 = vector.extract %134[0, 0, 0] : f32 from vector<1x1x1xf32>
    %cst_105 = arith.constant 0.000000e+00 : f32
    %136 = arith.addf %cst_105, %135 : f32
    %137 = arith.mulf %112, %128 : vector<8x32xf32>
    %138 = vector.broadcast %5 : vector<8x1xf32> to vector<8x32xf32>
    %139 = arith.mulf %137, %138 : vector<8x32xf32>
    %140 = vector.shape_cast %139 : vector<8x32xf32> to vector<1x8x32xf32>
    %cst_106 = arith.constant dense<0.000000e+00> : vector<1xf32>
    %141 = vector.multi_reduction <add>, %140, %cst_106 [1, 2] : vector<1x8x32xf32> to vector<1xf32>
    %142 = vector.shape_cast %141 : vector<1xf32> to vector<1x1x1xf32>
    %143 = vector.extract %142[0, 0, 0] : f32 from vector<1x1x1xf32>
    %144 = arith.addf %136, %143 : f32
    %145 = arith.mulf %120, %128 : vector<8x32xf32>
    %146 = vector.broadcast %5 : vector<8x1xf32> to vector<8x32xf32>
    %147 = arith.mulf %145, %146 : vector<8x32xf32>
    %148 = vector.shape_cast %147 : vector<8x32xf32> to vector<1x8x32xf32>
    %cst_107 = arith.constant dense<0.000000e+00> : vector<1xf32>
    %149 = vector.multi_reduction <add>, %148, %cst_107 [1, 2] : vector<1x8x32xf32> to vector<1xf32>
    %150 = vector.shape_cast %149 : vector<1xf32> to vector<1x1x1xf32>
    %151 = vector.extract %150[0, 0, 0] : f32 from vector<1x1x1xf32>
    %152 = arith.addf %144, %151 : f32
    %cst_108 = arith.constant 6.000000e+00 : f32
    %153 = arith.divf %152, %cst_108 : f32
    %c0_109 = arith.constant 0 : index
    %c0_110 = arith.constant 0 : index
    %c0_111 = arith.constant 0 : index
    %154 = vector.load %arg1[%c0_109, %c0_110, %c0_111] : memref<2x8x32xf32, #tpu.memory_space<vmem>>, vector<1x8x32xf32>
    %155 = vector.shape_cast %154 : vector<1x8x32xf32> to vector<8x32xf32>
    %156 = arith.mulf %53, %155 : vector<8x32xf32>
    %cst_112 = arith.constant dense<0.000000e+00> : vector<8xf32>
    %157 = vector.multi_reduction <add>, %156, %cst_112 [1] : vector<8x32xf32> to vector<8xf32>
    %158 = vector.shape_cast %157 : vector<8xf32> to vector<8x1xf32>
    %159 = arith.mulf %77, %155 : vector<8x32xf32>
    %cst_113 = arith.constant dense<0.000000e+00> : vector<8xf32>
    %160 = vector.multi_reduction <add>, %159, %cst_113 [1] : vector<8x32xf32> to vector<8xf32>
    %161 = vector.shape_cast %160 : vector<8xf32> to vector<8x1xf32>
    %162 = arith.mulf %101, %155 : vector<8x32xf32>
    %cst_114 = arith.constant dense<0.000000e+00> : vector<8xf32>
    %163 = vector.multi_reduction <add>, %162, %cst_114 [1] : vector<8x32xf32> to vector<8xf32>
    %164 = vector.shape_cast %163 : vector<8xf32> to vector<8x1xf32>
    %165 = arith.maximumf %158, %161 : vector<8x1xf32>
    %166 = arith.maximumf %165, %164 : vector<8x1xf32>
    %167 = arith.subf %158, %166 : vector<8x1xf32>
    %168 = math.exp %167 : vector<8x1xf32>
    %169 = arith.subf %161, %166 : vector<8x1xf32>
    %170 = math.exp %169 : vector<8x1xf32>
    %171 = arith.subf %164, %166 : vector<8x1xf32>
    %172 = math.exp %171 : vector<8x1xf32>
    %173 = arith.addf %168, %170 : vector<8x1xf32>
    %174 = arith.addf %173, %172 : vector<8x1xf32>
    %175 = arith.divf %168, %174 : vector<8x1xf32>
    %176 = arith.divf %170, %174 : vector<8x1xf32>
    %177 = arith.divf %172, %174 : vector<8x1xf32>
    %178 = vector.broadcast %175 : vector<8x1xf32> to vector<8x32xf32>
    %179 = arith.mulf %178, %56 : vector<8x32xf32>
    %cst_115 = arith.constant 9.99999997E-7 : f32
    %180 = vector.broadcast %cst_115 : f32 to vector<8x1xf32>
    %181 = arith.addf %175, %180 : vector<8x1xf32>
    %182 = math.log %181 : vector<8x1xf32>
    %183 = vector.broadcast %176 : vector<8x1xf32> to vector<8x32xf32>
    %184 = arith.mulf %183, %80 : vector<8x32xf32>
    %185 = arith.addf %179, %184 : vector<8x32xf32>
    %cst_116 = arith.constant 9.99999997E-7 : f32
    %186 = vector.broadcast %cst_116 : f32 to vector<8x1xf32>
    %187 = arith.addf %176, %186 : vector<8x1xf32>
    %188 = math.log %187 : vector<8x1xf32>
    %189 = arith.addf %182, %188 : vector<8x1xf32>
    %190 = vector.broadcast %177 : vector<8x1xf32> to vector<8x32xf32>
    %191 = arith.mulf %190, %104 : vector<8x32xf32>
    %192 = arith.addf %185, %191 : vector<8x32xf32>
    %cst_117 = arith.constant 9.99999997E-7 : f32
    %193 = vector.broadcast %cst_117 : f32 to vector<8x1xf32>
    %194 = arith.addf %177, %193 : vector<8x1xf32>
    %195 = math.log %194 : vector<8x1xf32>
    %196 = arith.addf %189, %195 : vector<8x1xf32>
    %cst_118 = arith.constant -0.00333333341 : f32
    %197 = vector.broadcast %cst_118 : f32 to vector<8x1xf32>
    %198 = arith.mulf %197, %196 : vector<8x1xf32>
    %199 = math.absf %153 : f32
    %cst_119 = arith.constant 0.00999999977 : f32
    %200 = arith.mulf %cst_119, %199 : f32
    %201 = vector.broadcast %200 : f32 to vector<8x1xf32>
    %202 = arith.addf %198, %201 : vector<8x1xf32>
    %c0_120 = arith.constant 0 : index
    %c2_121 = arith.constant 2 : index
    %c0_122 = arith.constant 0 : index
    %c0_123 = arith.constant 0 : index
    %203 = vector.load %arg3[%c0_120, %c2_121, %c0_122, %c0_123] : memref<2x4x32x32xf32, #tpu.memory_space<vmem>>, vector<1x1x32x32xf32>
    %204 = vector.shape_cast %203 : vector<1x1x32x32xf32> to vector<32x32xf32>
    %c0_124 = arith.constant 0 : index
    %c3_125 = arith.constant 3 : index
    %c0_126 = arith.constant 0 : index
    %205 = vector.load %arg5[%c0_124, %c3_125, %c0_126] : memref<2x13x32xf32, #tpu.memory_space<vmem>>, vector<1x1x32xf32>
    %206 = vector.shape_cast %205 : vector<1x1x32xf32> to vector<1x32xf32>
    %cst_127 = arith.constant dense<0.000000e+00> : vector<8x32xf32>
    %207 = tpu.matmul %192, %204, %cst_127 {dimension_numbers = #tpu.dot_dimension_numbers<[1], [0], [0], [1], [0, 0, 1, 1], [], []>} : vector<8x32xf32>, vector<32x32xf32>, vector<8x32xf32> -> vector<8x32xf32>
    %208 = vector.broadcast %206 : vector<1x32xf32> to vector<8x32xf32>
    %209 = arith.addf %207, %208 : vector<8x32xf32>
    %cst_128 = arith.constant 0.000000e+00 : f32
    %210 = vector.broadcast %cst_128 : f32 to vector<8x32xf32>
    %211 = arith.maximumf %209, %210 : vector<8x32xf32>
    %c0_129 = arith.constant 0 : index
    %c3_130 = arith.constant 3 : index
    %c0_131 = arith.constant 0 : index
    %c0_132 = arith.constant 0 : index
    %212 = vector.load %arg3[%c0_129, %c3_130, %c0_131, %c0_132] : memref<2x4x32x32xf32, #tpu.memory_space<vmem>>, vector<1x1x32x32xf32>
    %213 = vector.shape_cast %212 : vector<1x1x32x32xf32> to vector<32x32xf32>
    %c0_133 = arith.constant 0 : index
    %c4_134 = arith.constant 4 : index
    %c0_135 = arith.constant 0 : index
    %214 = vector.load %arg5[%c0_133, %c4_134, %c0_135] : memref<2x13x32xf32, #tpu.memory_space<vmem>>, vector<1x1x32xf32>
    %215 = vector.shape_cast %214 : vector<1x1x32xf32> to vector<1x32xf32>
    %cst_136 = arith.constant dense<0.000000e+00> : vector<8x32xf32>
    %216 = tpu.matmul %211, %213, %cst_136 {dimension_numbers = #tpu.dot_dimension_numbers<[1], [0], [0], [1], [0, 0, 1, 1], [], []>} : vector<8x32xf32>, vector<32x32xf32>, vector<8x32xf32> -> vector<8x32xf32>
    %217 = vector.broadcast %215 : vector<1x32xf32> to vector<8x32xf32>
    %218 = arith.addf %216, %217 : vector<8x32xf32>
    %cst_137 = arith.constant 0.000000e+00 : f32
    %219 = vector.broadcast %cst_137 : f32 to vector<8x32xf32>
    %220 = arith.maximumf %218, %219 : vector<8x32xf32>
    %c0_138 = arith.constant 0 : index
    %c5_139 = arith.constant 5 : index
    %c0_140 = arith.constant 0 : index
    %221 = vector.load %arg5[%c0_138, %c5_139, %c0_140] : memref<2x13x32xf32, #tpu.memory_space<vmem>>, vector<1x1x32xf32>
    %222 = vector.shape_cast %221 : vector<1x1x32xf32> to vector<1x32xf32>
    %c0_141 = arith.constant 0 : index
    %c6_142 = arith.constant 6 : index
    %c0_143 = arith.constant 0 : index
    %223 = vector.load %arg5[%c0_141, %c6_142, %c0_143] : memref<2x13x32xf32, #tpu.memory_space<vmem>>, vector<1x1x1xf32>
    %224 = vector.shape_cast %223 : vector<1x1x1xf32> to vector<1x1xf32>
    %225 = vector.broadcast %222 : vector<1x32xf32> to vector<8x32xf32>
    %226 = arith.mulf %220, %225 : vector<8x32xf32>
    %cst_144 = arith.constant dense<0.000000e+00> : vector<8xf32>
    %227 = vector.multi_reduction <add>, %226, %cst_144 [1] : vector<8x32xf32> to vector<8xf32>
    %228 = vector.shape_cast %227 : vector<8xf32> to vector<8x1xf32>
    %229 = vector.broadcast %224 : vector<1x1xf32> to vector<8x1xf32>
    %230 = arith.addf %228, %229 : vector<8x1xf32>
    %c0_145 = arith.constant 0 : index
    %c0_146 = arith.constant 0 : index
    %231 = vector.load %arg6[%c0_145, %c0_146] : memref<8x4xf32, #tpu.memory_space<vmem>>, vector<8x1xf32>
    tpu.vector_store %arg6[%c0_145, %c0_146], %230 {strides = array<i32>} : memref<8x4xf32, #tpu.memory_space<vmem>>, vector<8x1xf32>,
    %c0_147 = arith.constant 0 : index
    %c2_148 = arith.constant 2 : index
    %232 = vector.load %arg6[%c0_147, %c2_148] : memref<8x4xf32, #tpu.memory_space<vmem>>, vector<8x1xf32>
    tpu.vector_store %arg6[%c0_147, %c2_148], %202 {strides = array<i32>} : memref<8x4xf32, #tpu.memory_space<vmem>>, vector<8x1xf32>,
    %c1_149 = arith.constant 1 : index
    %c0_150 = arith.constant 0 : index
    %c0_151 = arith.constant 0 : index
    %233 = vector.load %arg2[%c1_149, %c0_150, %c0_151] : memref<2x16x32xf32, #tpu.memory_space<vmem>>, vector<1x16x32xf32>
    %234 = vector.shape_cast %233 : vector<1x16x32xf32> to vector<16x32xf32>
    %c1_152 = arith.constant 1 : index
    %c0_153 = arith.constant 0 : index
    %c0_154 = arith.constant 0 : index
    %235 = vector.load %arg5[%c1_152, %c0_153, %c0_154] : memref<2x13x32xf32, #tpu.memory_space<vmem>>, vector<1x1x32xf32>
    %236 = vector.shape_cast %235 : vector<1x1x32xf32> to vector<1x32xf32>
    %cst_155 = arith.constant dense<0.000000e+00> : vector<8x32xf32>
    %237 = tpu.matmul %0, %234, %cst_155 {dimension_numbers = #tpu.dot_dimension_numbers<[1], [0], [0], [1], [0, 0, 1, 1], [], []>} : vector<8x16xf32>, vector<16x32xf32>, vector<8x32xf32> -> vector<8x32xf32>
    %238 = vector.broadcast %236 : vector<1x32xf32> to vector<8x32xf32>
    %239 = arith.addf %237, %238 : vector<8x32xf32>
    %cst_156 = arith.constant 0.000000e+00 : f32
    %240 = vector.broadcast %cst_156 : f32 to vector<8x32xf32>
    %241 = arith.maximumf %239, %240 : vector<8x32xf32>
    %c1_157 = arith.constant 1 : index
    %c0_158 = arith.constant 0 : index
    %c0_159 = arith.constant 0 : index
    %c0_160 = arith.constant 0 : index
    %242 = vector.load %arg3[%c1_157, %c0_158, %c0_159, %c0_160] : memref<2x4x32x32xf32, #tpu.memory_space<vmem>>, vector<1x1x32x32xf32>
    %243 = vector.shape_cast %242 : vector<1x1x32x32xf32> to vector<32x32xf32>
    %c1_161 = arith.constant 1 : index
    %c1_162 = arith.constant 1 : index
    %c0_163 = arith.constant 0 : index
    %244 = vector.load %arg5[%c1_161, %c1_162, %c0_163] : memref<2x13x32xf32, #tpu.memory_space<vmem>>, vector<1x1x32xf32>
    %245 = vector.shape_cast %244 : vector<1x1x32xf32> to vector<1x32xf32>
    %cst_164 = arith.constant dense<0.000000e+00> : vector<8x32xf32>
    %246 = tpu.matmul %241, %243, %cst_164 {dimension_numbers = #tpu.dot_dimension_numbers<[1], [0], [0], [1], [0, 0, 1, 1], [], []>} : vector<8x32xf32>, vector<32x32xf32>, vector<8x32xf32> -> vector<8x32xf32>
    %247 = vector.broadcast %245 : vector<1x32xf32> to vector<8x32xf32>
    %248 = arith.addf %246, %247 : vector<8x32xf32>
    %cst_165 = arith.constant 0.000000e+00 : f32
    %249 = vector.broadcast %cst_165 : f32 to vector<8x32xf32>
    %250 = arith.maximumf %248, %249 : vector<8x32xf32>
    %c1_166 = arith.constant 1 : index
    %c1_167 = arith.constant 1 : index
    %c0_168 = arith.constant 0 : index
    %c0_169 = arith.constant 0 : index
    %251 = vector.load %arg3[%c1_166, %c1_167, %c0_168, %c0_169] : memref<2x4x32x32xf32, #tpu.memory_space<vmem>>, vector<1x1x32x32xf32>
    %252 = vector.shape_cast %251 : vector<1x1x32x32xf32> to vector<32x32xf32>
    %c1_170 = arith.constant 1 : index
    %c2_171 = arith.constant 2 : index
    %c0_172 = arith.constant 0 : index
    %253 = vector.load %arg5[%c1_170, %c2_171, %c0_172] : memref<2x13x32xf32, #tpu.memory_space<vmem>>, vector<1x1x32xf32>
    %254 = vector.shape_cast %253 : vector<1x1x32xf32> to vector<1x32xf32>
    %cst_173 = arith.constant dense<0.000000e+00> : vector<8x32xf32>
    %255 = tpu.matmul %250, %252, %cst_173 {dimension_numbers = #tpu.dot_dimension_numbers<[1], [0], [0], [1], [0, 0, 1, 1], [], []>} : vector<8x32xf32>, vector<32x32xf32>, vector<8x32xf32> -> vector<8x32xf32>
    %256 = vector.broadcast %254 : vector<1x32xf32> to vector<8x32xf32>
    %257 = arith.addf %255, %256 : vector<8x32xf32>
    %cst_174 = arith.constant 0.000000e+00 : f32
    %258 = vector.broadcast %cst_174 : f32 to vector<8x32xf32>
    %259 = arith.maximumf %257, %258 : vector<8x32xf32>
    %c1_175 = arith.constant 1 : index
    %c0_176 = arith.constant 0 : index
    %c0_177 = arith.constant 0 : index
    %c0_178 = arith.constant 0 : index
    %260 = vector.load %arg4[%c1_175, %c0_176, %c0_177, %c0_178] : memref<2x12x32x32xf32, #tpu.memory_space<vmem>>, vector<1x1x32x32xf32>
    %261 = vector.shape_cast %260 : vector<1x1x32x32xf32> to vector<32x32xf32>
    %c1_179 = arith.constant 1 : index
    %c7_180 = arith.constant 7 : index
    %c0_181 = arith.constant 0 : index
    %262 = vector.load %arg5[%c1_179, %c7_180, %c0_181] : memref<2x13x32xf32, #tpu.memory_space<vmem>>, vector<1x1x32xf32>
    %263 = vector.shape_cast %262 : vector<1x1x32xf32> to vector<1x32xf32>
    %cst_182 = arith.constant dense<0.000000e+00> : vector<8x32xf32>
    %264 = tpu.matmul %259, %261, %cst_182 {dimension_numbers = #tpu.dot_dimension_numbers<[1], [0], [0], [1], [0, 0, 1, 1], [], []>} : vector<8x32xf32>, vector<32x32xf32>, vector<8x32xf32> -> vector<8x32xf32>
    %265 = vector.broadcast %263 : vector<1x32xf32> to vector<8x32xf32>
    %266 = arith.addf %264, %265 : vector<8x32xf32>
    %cst_183 = arith.constant 0.000000e+00 : f32
    %267 = vector.broadcast %cst_183 : f32 to vector<8x32xf32>
    %268 = arith.maximumf %266, %267 : vector<8x32xf32>
    %c1_184 = arith.constant 1 : index
    %c3_185 = arith.constant 3 : index
    %c0_186 = arith.constant 0 : index
    %c0_187 = arith.constant 0 : index
    %269 = vector.load %arg4[%c1_184, %c3_185, %c0_186, %c0_187] : memref<2x12x32x32xf32, #tpu.memory_space<vmem>>, vector<1x1x32x32xf32>
    %270 = vector.shape_cast %269 : vector<1x1x32x32xf32> to vector<32x32xf32>
    %c1_188 = arith.constant 1 : index
    %c10_189 = arith.constant 10 : index
    %c0_190 = arith.constant 0 : index
    %271 = vector.load %arg5[%c1_188, %c10_189, %c0_190] : memref<2x13x32xf32, #tpu.memory_space<vmem>>, vector<1x1x32xf32>
    %272 = vector.shape_cast %271 : vector<1x1x32xf32> to vector<1x32xf32>
    %cst_191 = arith.constant dense<0.000000e+00> : vector<8x32xf32>
    %273 = tpu.matmul %268, %270, %cst_191 {dimension_numbers = #tpu.dot_dimension_numbers<[1], [0], [0], [1], [0, 0, 1, 1], [], []>} : vector<8x32xf32>, vector<32x32xf32>, vector<8x32xf32> -> vector<8x32xf32>
    %274 = vector.broadcast %272 : vector<1x32xf32> to vector<8x32xf32>
    %275 = arith.addf %273, %274 : vector<8x32xf32>
    %cst_192 = arith.constant 0.000000e+00 : f32
    %276 = vector.broadcast %cst_192 : f32 to vector<8x32xf32>
    %277 = arith.maximumf %275, %276 : vector<8x32xf32>
    %c1_193 = arith.constant 1 : index
    %c6_194 = arith.constant 6 : index
    %c0_195 = arith.constant 0 : index
    %c0_196 = arith.constant 0 : index
    %278 = vector.load %arg4[%c1_193, %c6_194, %c0_195, %c0_196] : memref<2x12x32x32xf32, #tpu.memory_space<vmem>>, vector<1x1x32x32xf32>
    %279 = vector.shape_cast %278 : vector<1x1x32x32xf32> to vector<32x32xf32>
    %cst_197 = arith.constant dense<0.000000e+00> : vector<8x32xf32>
    %280 = tpu.matmul %277, %279, %cst_197 {dimension_numbers = #tpu.dot_dimension_numbers<[1], [0], [0], [1], [0, 0, 1, 1], [], []>} : vector<8x32xf32>, vector<32x32xf32>, vector<8x32xf32> -> vector<8x32xf32>
    %c1_198 = arith.constant 1 : index
    %c9_199 = arith.constant 9 : index
    %c0_200 = arith.constant 0 : index
    %c0_201 = arith.constant 0 : index
    %281 = vector.load %arg4[%c1_198, %c9_199, %c0_200, %c0_201] : memref<2x12x32x32xf32, #tpu.memory_space<vmem>>, vector<1x1x32x32xf32>
    %282 = vector.shape_cast %281 : vector<1x1x32x32xf32> to vector<32x32xf32>
    %cst_202 = arith.constant dense<0.000000e+00> : vector<8x32xf32>
    %283 = tpu.matmul %277, %282, %cst_202 {dimension_numbers = #tpu.dot_dimension_numbers<[1], [0], [0], [1], [0, 0, 1, 1], [], []>} : vector<8x32xf32>, vector<32x32xf32>, vector<8x32xf32> -> vector<8x32xf32>
    %c1_203 = arith.constant 1 : index
    %c1_204 = arith.constant 1 : index
    %c0_205 = arith.constant 0 : index
    %c0_206 = arith.constant 0 : index
    %284 = vector.load %arg4[%c1_203, %c1_204, %c0_205, %c0_206] : memref<2x12x32x32xf32, #tpu.memory_space<vmem>>, vector<1x1x32x32xf32>
    %285 = vector.shape_cast %284 : vector<1x1x32x32xf32> to vector<32x32xf32>
    %c1_207 = arith.constant 1 : index
    %c8_208 = arith.constant 8 : index
    %c0_209 = arith.constant 0 : index
    %286 = vector.load %arg5[%c1_207, %c8_208, %c0_209] : memref<2x13x32xf32, #tpu.memory_space<vmem>>, vector<1x1x32xf32>
    %287 = vector.shape_cast %286 : vector<1x1x32xf32> to vector<1x32xf32>
    %cst_210 = arith.constant dense<0.000000e+00> : vector<8x32xf32>
    %288 = tpu.matmul %259, %285, %cst_210 {dimension_numbers = #tpu.dot_dimension_numbers<[1], [0], [0], [1], [0, 0, 1, 1], [], []>} : vector<8x32xf32>, vector<32x32xf32>, vector<8x32xf32> -> vector<8x32xf32>
    %289 = vector.broadcast %287 : vector<1x32xf32> to vector<8x32xf32>
    %290 = arith.addf %288, %289 : vector<8x32xf32>
    %cst_211 = arith.constant 0.000000e+00 : f32
    %291 = vector.broadcast %cst_211 : f32 to vector<8x32xf32>
    %292 = arith.maximumf %290, %291 : vector<8x32xf32>
    %c1_212 = arith.constant 1 : index
    %c4_213 = arith.constant 4 : index
    %c0_214 = arith.constant 0 : index
    %c0_215 = arith.constant 0 : index
    %293 = vector.load %arg4[%c1_212, %c4_213, %c0_214, %c0_215] : memref<2x12x32x32xf32, #tpu.memory_space<vmem>>, vector<1x1x32x32xf32>
    %294 = vector.shape_cast %293 : vector<1x1x32x32xf32> to vector<32x32xf32>
    %c1_216 = arith.constant 1 : index
    %c11_217 = arith.constant 11 : index
    %c0_218 = arith.constant 0 : index
    %295 = vector.load %arg5[%c1_216, %c11_217, %c0_218] : memref<2x13x32xf32, #tpu.memory_space<vmem>>, vector<1x1x32xf32>
    %296 = vector.shape_cast %295 : vector<1x1x32xf32> to vector<1x32xf32>
    %cst_219 = arith.constant dense<0.000000e+00> : vector<8x32xf32>
    %297 = tpu.matmul %292, %294, %cst_219 {dimension_numbers = #tpu.dot_dimension_numbers<[1], [0], [0], [1], [0, 0, 1, 1], [], []>} : vector<8x32xf32>, vector<32x32xf32>, vector<8x32xf32> -> vector<8x32xf32>
    %298 = vector.broadcast %296 : vector<1x32xf32> to vector<8x32xf32>
    %299 = arith.addf %297, %298 : vector<8x32xf32>
    %cst_220 = arith.constant 0.000000e+00 : f32
    %300 = vector.broadcast %cst_220 : f32 to vector<8x32xf32>
    %301 = arith.maximumf %299, %300 : vector<8x32xf32>
    %c1_221 = arith.constant 1 : index
    %c7_222 = arith.constant 7 : index
    %c0_223 = arith.constant 0 : index
    %c0_224 = arith.constant 0 : index
    %302 = vector.load %arg4[%c1_221, %c7_222, %c0_223, %c0_224] : memref<2x12x32x32xf32, #tpu.memory_space<vmem>>, vector<1x1x32x32xf32>
    %303 = vector.shape_cast %302 : vector<1x1x32x32xf32> to vector<32x32xf32>
    %cst_225 = arith.constant dense<0.000000e+00> : vector<8x32xf32>
    %304 = tpu.matmul %301, %303, %cst_225 {dimension_numbers = #tpu.dot_dimension_numbers<[1], [0], [0], [1], [0, 0, 1, 1], [], []>} : vector<8x32xf32>, vector<32x32xf32>, vector<8x32xf32> -> vector<8x32xf32>
    %c1_226 = arith.constant 1 : index
    %c10_227 = arith.constant 10 : index
    %c0_228 = arith.constant 0 : index
    %c0_229 = arith.constant 0 : index
    %305 = vector.load %arg4[%c1_226, %c10_227, %c0_228, %c0_229] : memref<2x12x32x32xf32, #tpu.memory_space<vmem>>, vector<1x1x32x32xf32>
    %306 = vector.shape_cast %305 : vector<1x1x32x32xf32> to vector<32x32xf32>
    %cst_230 = arith.constant dense<0.000000e+00> : vector<8x32xf32>
    %307 = tpu.matmul %301, %306, %cst_230 {dimension_numbers = #tpu.dot_dimension_numbers<[1], [0], [0], [1], [0, 0, 1, 1], [], []>} : vector<8x32xf32>, vector<32x32xf32>, vector<8x32xf32> -> vector<8x32xf32>
    %c1_231 = arith.constant 1 : index
    %c2_232 = arith.constant 2 : index
    %c0_233 = arith.constant 0 : index
    %c0_234 = arith.constant 0 : index
    %308 = vector.load %arg4[%c1_231, %c2_232, %c0_233, %c0_234] : memref<2x12x32x32xf32, #tpu.memory_space<vmem>>, vector<1x1x32x32xf32>
    %309 = vector.shape_cast %308 : vector<1x1x32x32xf32> to vector<32x32xf32>
    %c1_235 = arith.constant 1 : index
    %c9_236 = arith.constant 9 : index
    %c0_237 = arith.constant 0 : index
    %310 = vector.load %arg5[%c1_235, %c9_236, %c0_237] : memref<2x13x32xf32, #tpu.memory_space<vmem>>, vector<1x1x32xf32>
    %311 = vector.shape_cast %310 : vector<1x1x32xf32> to vector<1x32xf32>
    %cst_238 = arith.constant dense<0.000000e+00> : vector<8x32xf32>
    %312 = tpu.matmul %259, %309, %cst_238 {dimension_numbers = #tpu.dot_dimension_numbers<[1], [0], [0], [1], [0, 0, 1, 1], [], []>} : vector<8x32xf32>, vector<32x32xf32>, vector<8x32xf32> -> vector<8x32xf32>
    %313 = vector.broadcast %311 : vector<1x32xf32> to vector<8x32xf32>
    %314 = arith.addf %312, %313 : vector<8x32xf32>
    %cst_239 = arith.constant 0.000000e+00 : f32
    %315 = vector.broadcast %cst_239 : f32 to vector<8x32xf32>
    %316 = arith.maximumf %314, %315 : vector<8x32xf32>
    %c1_240 = arith.constant 1 : index
    %c5_241 = arith.constant 5 : index
    %c0_242 = arith.constant 0 : index
    %c0_243 = arith.constant 0 : index
    %317 = vector.load %arg4[%c1_240, %c5_241, %c0_242, %c0_243] : memref<2x12x32x32xf32, #tpu.memory_space<vmem>>, vector<1x1x32x32xf32>
    %318 = vector.shape_cast %317 : vector<1x1x32x32xf32> to vector<32x32xf32>
    %c1_244 = arith.constant 1 : index
    %c12_245 = arith.constant 12 : index
    %c0_246 = arith.constant 0 : index
    %319 = vector.load %arg5[%c1_244, %c12_245, %c0_246] : memref<2x13x32xf32, #tpu.memory_space<vmem>>, vector<1x1x32xf32>
    %320 = vector.shape_cast %319 : vector<1x1x32xf32> to vector<1x32xf32>
    %cst_247 = arith.constant dense<0.000000e+00> : vector<8x32xf32>
    %321 = tpu.matmul %316, %318, %cst_247 {dimension_numbers = #tpu.dot_dimension_numbers<[1], [0], [0], [1], [0, 0, 1, 1], [], []>} : vector<8x32xf32>, vector<32x32xf32>, vector<8x32xf32> -> vector<8x32xf32>
    %322 = vector.broadcast %320 : vector<1x32xf32> to vector<8x32xf32>
    %323 = arith.addf %321, %322 : vector<8x32xf32>
    %cst_248 = arith.constant 0.000000e+00 : f32
    %324 = vector.broadcast %cst_248 : f32 to vector<8x32xf32>
    %325 = arith.maximumf %323, %324 : vector<8x32xf32>
    %c1_249 = arith.constant 1 : index
    %c8_250 = arith.constant 8 : index
    %c0_251 = arith.constant 0 : index
    %c0_252 = arith.constant 0 : index
    %326 = vector.load %arg4[%c1_249, %c8_250, %c0_251, %c0_252] : memref<2x12x32x32xf32, #tpu.memory_space<vmem>>, vector<1x1x32x32xf32>
    %327 = vector.shape_cast %326 : vector<1x1x32x32xf32> to vector<32x32xf32>
    %cst_253 = arith.constant dense<0.000000e+00> : vector<8x32xf32>
    %328 = tpu.matmul %325, %327, %cst_253 {dimension_numbers = #tpu.dot_dimension_numbers<[1], [0], [0], [1], [0, 0, 1, 1], [], []>} : vector<8x32xf32>, vector<32x32xf32>, vector<8x32xf32> -> vector<8x32xf32>
    %c1_254 = arith.constant 1 : index
    %c11_255 = arith.constant 11 : index
    %c0_256 = arith.constant 0 : index
    %c0_257 = arith.constant 0 : index
    %329 = vector.load %arg4[%c1_254, %c11_255, %c0_256, %c0_257] : memref<2x12x32x32xf32, #tpu.memory_space<vmem>>, vector<1x1x32x32xf32>
    %330 = vector.shape_cast %329 : vector<1x1x32x32xf32> to vector<32x32xf32>
    %cst_258 = arith.constant dense<0.000000e+00> : vector<8x32xf32>
    %331 = tpu.matmul %325, %330, %cst_258 {dimension_numbers = #tpu.dot_dimension_numbers<[1], [0], [0], [1], [0, 0, 1, 1], [], []>} : vector<8x32xf32>, vector<32x32xf32>, vector<8x32xf32> -> vector<8x32xf32>
    %332 = arith.mulf %283, %283 : vector<8x32xf32>
    %cst_259 = arith.constant dense<0.000000e+00> : vector<8xf32>
    %333 = vector.multi_reduction <add>, %332, %cst_259 [1] : vector<8x32xf32> to vector<8xf32>
    %334 = vector.shape_cast %333 : vector<8xf32> to vector<8x1xf32>
    %cst_260 = arith.constant 1.000000e-24 : f32
    %335 = vector.broadcast %cst_260 : f32 to vector<8x1xf32>
    %336 = arith.maximumf %334, %335 : vector<8x1xf32>
    %337 = math.rsqrt %336 : vector<8x1xf32>
    %338 = vector.broadcast %337 : vector<8x1xf32> to vector<8x32xf32>
    %339 = arith.mulf %283, %338 : vector<8x32xf32>
    %340 = arith.mulf %307, %307 : vector<8x32xf32>
    %cst_261 = arith.constant dense<0.000000e+00> : vector<8xf32>
    %341 = vector.multi_reduction <add>, %340, %cst_261 [1] : vector<8x32xf32> to vector<8xf32>
    %342 = vector.shape_cast %341 : vector<8xf32> to vector<8x1xf32>
    %cst_262 = arith.constant 1.000000e-24 : f32
    %343 = vector.broadcast %cst_262 : f32 to vector<8x1xf32>
    %344 = arith.maximumf %342, %343 : vector<8x1xf32>
    %345 = math.rsqrt %344 : vector<8x1xf32>
    %346 = vector.broadcast %345 : vector<8x1xf32> to vector<8x32xf32>
    %347 = arith.mulf %307, %346 : vector<8x32xf32>
    %348 = arith.mulf %331, %331 : vector<8x32xf32>
    %cst_263 = arith.constant dense<0.000000e+00> : vector<8xf32>
    %349 = vector.multi_reduction <add>, %348, %cst_263 [1] : vector<8x32xf32> to vector<8xf32>
    %350 = vector.shape_cast %349 : vector<8xf32> to vector<8x1xf32>
    %cst_264 = arith.constant 1.000000e-24 : f32
    %351 = vector.broadcast %cst_264 : f32 to vector<8x1xf32>
    %352 = arith.maximumf %350, %351 : vector<8x1xf32>
    %353 = math.rsqrt %352 : vector<8x1xf32>
    %354 = vector.broadcast %353 : vector<8x1xf32> to vector<8x32xf32>
    %355 = arith.mulf %331, %354 : vector<8x32xf32>
    %356 = arith.mulf %339, %347 : vector<8x32xf32>
    %357 = vector.broadcast %5 : vector<8x1xf32> to vector<8x32xf32>
    %358 = arith.mulf %356, %357 : vector<8x32xf32>
    %359 = vector.shape_cast %358 : vector<8x32xf32> to vector<1x8x32xf32>
    %cst_265 = arith.constant dense<0.000000e+00> : vector<1xf32>
    %360 = vector.multi_reduction <add>, %359, %cst_265 [1, 2] : vector<1x8x32xf32> to vector<1xf32>
    %361 = vector.shape_cast %360 : vector<1xf32> to vector<1x1x1xf32>
    %362 = vector.extract %361[0, 0, 0] : f32 from vector<1x1x1xf32>
    %cst_266 = arith.constant 0.000000e+00 : f32
    %363 = arith.addf %cst_266, %362 : f32
    %364 = arith.mulf %339, %355 : vector<8x32xf32>
    %365 = vector.broadcast %5 : vector<8x1xf32> to vector<8x32xf32>
    %366 = arith.mulf %364, %365 : vector<8x32xf32>
    %367 = vector.shape_cast %366 : vector<8x32xf32> to vector<1x8x32xf32>
    %cst_267 = arith.constant dense<0.000000e+00> : vector<1xf32>
    %368 = vector.multi_reduction <add>, %367, %cst_267 [1, 2] : vector<1x8x32xf32> to vector<1xf32>
    %369 = vector.shape_cast %368 : vector<1xf32> to vector<1x1x1xf32>
    %370 = vector.extract %369[0, 0, 0] : f32 from vector<1x1x1xf32>
    %371 = arith.addf %363, %370 : f32
    %372 = arith.mulf %347, %355 : vector<8x32xf32>
    %373 = vector.broadcast %5 : vector<8x1xf32> to vector<8x32xf32>
    %374 = arith.mulf %372, %373 : vector<8x32xf32>
    %375 = vector.shape_cast %374 : vector<8x32xf32> to vector<1x8x32xf32>
    %cst_268 = arith.constant dense<0.000000e+00> : vector<1xf32>
    %376 = vector.multi_reduction <add>, %375, %cst_268 [1, 2] : vector<1x8x32xf32> to vector<1xf32>
    %377 = vector.shape_cast %376 : vector<1xf32> to vector<1x1x1xf32>
    %378 = vector.extract %377[0, 0, 0] : f32 from vector<1x1x1xf32>
    %379 = arith.addf %371, %378 : f32
    %cst_269 = arith.constant 6.000000e+00 : f32
    %380 = arith.divf %379, %cst_269 : f32
    %c1_270 = arith.constant 1 : index
    %c0_271 = arith.constant 0 : index
    %c0_272 = arith.constant 0 : index
    %381 = vector.load %arg1[%c1_270, %c0_271, %c0_272] : memref<2x8x32xf32, #tpu.memory_space<vmem>>, vector<1x8x32xf32>
    %382 = vector.shape_cast %381 : vector<1x8x32xf32> to vector<8x32xf32>
    %383 = arith.mulf %280, %382 : vector<8x32xf32>
    %cst_273 = arith.constant dense<0.000000e+00> : vector<8xf32>
    %384 = vector.multi_reduction <add>, %383, %cst_273 [1] : vector<8x32xf32> to vector<8xf32>
    %385 = vector.shape_cast %384 : vector<8xf32> to vector<8x1xf32>
    %386 = arith.mulf %304, %382 : vector<8x32xf32>
    %cst_274 = arith.constant dense<0.000000e+00> : vector<8xf32>
    %387 = vector.multi_reduction <add>, %386, %cst_274 [1] : vector<8x32xf32> to vector<8xf32>
    %388 = vector.shape_cast %387 : vector<8xf32> to vector<8x1xf32>
    %389 = arith.mulf %328, %382 : vector<8x32xf32>
    %cst_275 = arith.constant dense<0.000000e+00> : vector<8xf32>
    %390 = vector.multi_reduction <add>, %389, %cst_275 [1] : vector<8x32xf32> to vector<8xf32>
    %391 = vector.shape_cast %390 : vector<8xf32> to vector<8x1xf32>
    %392 = arith.maximumf %385, %388 : vector<8x1xf32>
    %393 = arith.maximumf %392, %391 : vector<8x1xf32>
    %394 = arith.subf %385, %393 : vector<8x1xf32>
    %395 = math.exp %394 : vector<8x1xf32>
    %396 = arith.subf %388, %393 : vector<8x1xf32>
    %397 = math.exp %396 : vector<8x1xf32>
    %398 = arith.subf %391, %393 : vector<8x1xf32>
    %399 = math.exp %398 : vector<8x1xf32>
    %400 = arith.addf %395, %397 : vector<8x1xf32>
    %401 = arith.addf %400, %399 : vector<8x1xf32>
    %402 = arith.divf %395, %401 : vector<8x1xf32>
    %403 = arith.divf %397, %401 : vector<8x1xf32>
    %404 = arith.divf %399, %401 : vector<8x1xf32>
    %405 = vector.broadcast %402 : vector<8x1xf32> to vector<8x32xf32>
    %406 = arith.mulf %405, %283 : vector<8x32xf32>
    %cst_276 = arith.constant 9.99999997E-7 : f32
    %407 = vector.broadcast %cst_276 : f32 to vector<8x1xf32>
    %408 = arith.addf %402, %407 : vector<8x1xf32>
    %409 = math.log %408 : vector<8x1xf32>
    %410 = vector.broadcast %403 : vector<8x1xf32> to vector<8x32xf32>
    %411 = arith.mulf %410, %307 : vector<8x32xf32>
    %412 = arith.addf %406, %411 : vector<8x32xf32>
    %cst_277 = arith.constant 9.99999997E-7 : f32
    %413 = vector.broadcast %cst_277 : f32 to vector<8x1xf32>
    %414 = arith.addf %403, %413 : vector<8x1xf32>
    %415 = math.log %414 : vector<8x1xf32>
    %416 = arith.addf %409, %415 : vector<8x1xf32>
    %417 = vector.broadcast %404 : vector<8x1xf32> to vector<8x32xf32>
    %418 = arith.mulf %417, %331 : vector<8x32xf32>
    %419 = arith.addf %412, %418 : vector<8x32xf32>
    %cst_278 = arith.constant 9.99999997E-7 : f32
    %420 = vector.broadcast %cst_278 : f32 to vector<8x1xf32>
    %421 = arith.addf %404, %420 : vector<8x1xf32>
    %422 = math.log %421 : vector<8x1xf32>
    %423 = arith.addf %416, %422 : vector<8x1xf32>
    %cst_279 = arith.constant -0.00333333341 : f32
    %424 = vector.broadcast %cst_279 : f32 to vector<8x1xf32>
    %425 = arith.mulf %424, %423 : vector<8x1xf32>
    %426 = math.absf %380 : f32
    %cst_280 = arith.constant 0.00999999977 : f32
    %427 = arith.mulf %cst_280, %426 : f32
    %428 = vector.broadcast %427 : f32 to vector<8x1xf32>
    %429 = arith.addf %425, %428 : vector<8x1xf32>
    %c1_281 = arith.constant 1 : index
    %c2_282 = arith.constant 2 : index
    %c0_283 = arith.constant 0 : index
    %c0_284 = arith.constant 0 : index
    %430 = vector.load %arg3[%c1_281, %c2_282, %c0_283, %c0_284] : memref<2x4x32x32xf32, #tpu.memory_space<vmem>>, vector<1x1x32x32xf32>
    %431 = vector.shape_cast %430 : vector<1x1x32x32xf32> to vector<32x32xf32>
    %c1_285 = arith.constant 1 : index
    %c3_286 = arith.constant 3 : index
    %c0_287 = arith.constant 0 : index
    %432 = vector.load %arg5[%c1_285, %c3_286, %c0_287] : memref<2x13x32xf32, #tpu.memory_space<vmem>>, vector<1x1x32xf32>
    %433 = vector.shape_cast %432 : vector<1x1x32xf32> to vector<1x32xf32>
    %cst_288 = arith.constant dense<0.000000e+00> : vector<8x32xf32>
    %434 = tpu.matmul %419, %431, %cst_288 {dimension_numbers = #tpu.dot_dimension_numbers<[1], [0], [0], [1], [0, 0, 1, 1], [], []>} : vector<8x32xf32>, vector<32x32xf32>, vector<8x32xf32> -> vector<8x32xf32>
    %435 = vector.broadcast %433 : vector<1x32xf32> to vector<8x32xf32>
    %436 = arith.addf %434, %435 : vector<8x32xf32>
    %cst_289 = arith.constant 0.000000e+00 : f32
    %437 = vector.broadcast %cst_289 : f32 to vector<8x32xf32>
    %438 = arith.maximumf %436, %437 : vector<8x32xf32>
    %c1_290 = arith.constant 1 : index
    %c3_291 = arith.constant 3 : index
    %c0_292 = arith.constant 0 : index
    %c0_293 = arith.constant 0 : index
    %439 = vector.load %arg3[%c1_290, %c3_291, %c0_292, %c0_293] : memref<2x4x32x32xf32, #tpu.memory_space<vmem>>, vector<1x1x32x32xf32>
    %440 = vector.shape_cast %439 : vector<1x1x32x32xf32> to vector<32x32xf32>
    %c1_294 = arith.constant 1 : index
    %c4_295 = arith.constant 4 : index
    %c0_296 = arith.constant 0 : index
    %441 = vector.load %arg5[%c1_294, %c4_295, %c0_296] : memref<2x13x32xf32, #tpu.memory_space<vmem>>, vector<1x1x32xf32>
    %442 = vector.shape_cast %441 : vector<1x1x32xf32> to vector<1x32xf32>
    %cst_297 = arith.constant dense<0.000000e+00> : vector<8x32xf32>
    %443 = tpu.matmul %438, %440, %cst_297 {dimension_numbers = #tpu.dot_dimension_numbers<[1], [0], [0], [1], [0, 0, 1, 1], [], []>} : vector<8x32xf32>, vector<32x32xf32>, vector<8x32xf32> -> vector<8x32xf32>
    %444 = vector.broadcast %442 : vector<1x32xf32> to vector<8x32xf32>
    %445 = arith.addf %443, %444 : vector<8x32xf32>
    %cst_298 = arith.constant 0.000000e+00 : f32
    %446 = vector.broadcast %cst_298 : f32 to vector<8x32xf32>
    %447 = arith.maximumf %445, %446 : vector<8x32xf32>
    %c1_299 = arith.constant 1 : index
    %c5_300 = arith.constant 5 : index
    %c0_301 = arith.constant 0 : index
    %448 = vector.load %arg5[%c1_299, %c5_300, %c0_301] : memref<2x13x32xf32, #tpu.memory_space<vmem>>, vector<1x1x32xf32>
    %449 = vector.shape_cast %448 : vector<1x1x32xf32> to vector<1x32xf32>
    %c1_302 = arith.constant 1 : index
    %c6_303 = arith.constant 6 : index
    %c0_304 = arith.constant 0 : index
    %450 = vector.load %arg5[%c1_302, %c6_303, %c0_304] : memref<2x13x32xf32, #tpu.memory_space<vmem>>, vector<1x1x1xf32>
    %451 = vector.shape_cast %450 : vector<1x1x1xf32> to vector<1x1xf32>
    %452 = vector.broadcast %449 : vector<1x32xf32> to vector<8x32xf32>
    %453 = arith.mulf %447, %452 : vector<8x32xf32>
    %cst_305 = arith.constant dense<0.000000e+00> : vector<8xf32>
    %454 = vector.multi_reduction <add>, %453, %cst_305 [1] : vector<8x32xf32> to vector<8xf32>
    %455 = vector.shape_cast %454 : vector<8xf32> to vector<8x1xf32>
    %456 = vector.broadcast %451 : vector<1x1xf32> to vector<8x1xf32>
    %457 = arith.addf %455, %456 : vector<8x1xf32>
    %c0_306 = arith.constant 0 : index
    %c1_307 = arith.constant 1 : index
    %458 = vector.load %arg6[%c0_306, %c1_307] : memref<8x4xf32, #tpu.memory_space<vmem>>, vector<8x1xf32>
    tpu.vector_store %arg6[%c0_306, %c1_307], %457 {strides = array<i32>} : memref<8x4xf32, #tpu.memory_space<vmem>>, vector<8x1xf32>,
    %c0_308 = arith.constant 0 : index
    %c3_309 = arith.constant 3 : index
    %459 = vector.load %arg6[%c0_308, %c3_309] : memref<8x4xf32, #tpu.memory_space<vmem>>, vector<8x1xf32>
    tpu.vector_store %arg6[%c0_308, %c3_309], %429 {strides = array<i32>} : memref<8x4xf32, #tpu.memory_space<vmem>>, vector<8x1xf32>,
    return
  }
}

</mosaic_0001>

<bundles_post_ra>
// kernel: tpu_custom_call.1
= control target key start
LH: loop header
LB: loop body
LE: loop exit
PB: predicated region body
PF: predicated region fallthrough
CT: control target
= control target key end

     0   :  { %11 = vsyncpa [#allocation3], 0  ;;  %s1903_s0 = inlined_call_operand.vmem [shape: f32[8,16], index: 0, kind: input, shape index: {}]   ;;  %s1904_s1 = inlined_call_operand.vmem [shape: f32[2,8,32], index: 1, kind: input, shape index: {}]   ;;  %s1905_s2 = inlined_call_operand.vmem [shape: f32[2,16,32], index: 2, kind: input, shape index: {}]   ;;  %s1906_s3 = inlined_call_operand.hbm [shape: f32[2,4,32,32], index: 3, kind: input, shape index: {}]   ;;  %s1907_s4 = inlined_call_operand.hbm [shape: f32[2,12,32,32], index: 4, kind: input, shape index: {}]   ;;  %s1908_s5 = inlined_call_operand.vmem [shape: f32[2,13,32], index: 5, kind: input, shape index: {}]   ;;  %s1909_s6 = inlined_call_operand.vmem [shape: f32[8,4], index: 6, kind: output, shape index: {}]  }
   0x1   :  { %s23_s23 = sshll.u32 %s1906_s3, 4  ;;  %s24_s23 = int_to_ptr.hbm [resolvable:$true] %s23_s23 }
   0x2   :  { %12 = vsyncpa [#allocation5], 0  ;;  %s1591_s24 = smov [#allocation2]   ;;  %s36_s28 = sshll.u32 %s1907_s4, 4  ;;  %s37_s28 = int_to_ptr.hbm [resolvable:$true] %s36_s28 }
   0x3   :  { %s25_s25 = sshll.u32 %s1591_s24, 4  ;;  %s1592_s29 = smov 128   ;;  %s26_s25 = int_to_ptr.vmem [resolvable:$true] %s25_s25 }
   0x4   :  { %s1593_s30 = smov 8   ;;  %s1594_s7 = smov [#allocation4]  }
   0x5   :  { %31 = dma.hbm_to_vmem [thread:$0]  %s24_s23, 4096, %s26_s25, [#allocation3], %s1592_s29, %s1592_s29, %s1593_s30  }
   0x6   :  { %s38_s8 = sshll.u32 %s1594_s7, 4  ;;  %s39_s8 = int_to_ptr.vmem [resolvable:$true] %s38_s8 }
   0x7   :  { %44 = dma.hbm_to_vmem [thread:$0]  %s37_s28, 12288, %s39_s8, [#allocation5], %s1592_s29, %s1592_s29, %s1593_s30  }
   0x8   :  { %1587 = dma.done.wait [#allocation3], 4096  }
   0x9   :  { %1588 = vsyncadd [#allocation3], 4294963200 }
   0xa   :  { %1589 = dma.done.wait [#allocation5], 12288  }
   0xb   :  { %1590 = vsyncadd [#allocation5], 4294955008  ;;  %v62_v0 = vld [vmem:[%s1905_s2 + $0x8] sm:$0xff]  ;;  %v61_v1 = vld [vmem:[%s1905_s2] sm:$0xff]  ;;  %vm65_vm0 = vcmask 130048   ;;  %vm96_vm1 = vcmask 261120  }
   0xc   :  { %83 = vmatpush.msra.mxu0 %v62_v0  ;;  %v1648_v2 = vld [vmem:[%s1903_s0] sm:$0xff]  ;;  %v93_v3 = vld [vmem:[#allocation2 + $0x18] sm:$0xff]  ;;  %v92_v4 = vld [vmem:[#allocation2 + $0x10] sm:$0xff]  ;;  %s1597_s9 = smov 1  }
   0xd   :  { %112 = vmatpush.msra.mxu1 %v93_v3  ;;  %v91_v5 = vld [vmem:[#allocation2 + $0x8] sm:$0xff]  ;;  %v90_v6 = vld [vmem:[#allocation2] sm:$0xff]  ;;  %v125_v7 = vld [vmem:[#allocation2 + $0x38] sm:$0xff] }
   0xe   :  { %84 = vmatpush.msra.mxu0 %v61_v1  ;;  %143 = vmatpush.msra.mxu2 %v125_v7  ;;  %v1471_v8 = vld [vmem:[%s1908_s5] ss:$0 sm:$0xff]  ;;  %v124_v12 = vld [vmem:[#allocation2 + $0x30] sm:$0xff]  ;;  %v123_v13 = vld [vmem:[#allocation2 + $0x28] sm:$0xff] }
   0xf   :  { %1400 = vmatmul.msk.f32.vlgmr.msra.gmra.mxu0 %vm65_vm0, %v1648_v2  ;;  %113 = vmatpush.msra.mxu1 %v92_v4  ;;  %v122_v14 = vld [vmem:[#allocation2 + $0x20] sm:$0xff]  ;;  %v155_v15 = vld [vmem:[#allocation4 + $0x18] sm:$0xff]  ;;  %v154_v20 = vld [vmem:[#allocation4 + $0x10] sm:$0xff] }
  0x10   :  { %144 = vmatpush.msra.mxu2 %v124_v12  ;;  %173 = vmatpush.msra.mxu3 %v155_v15  ;;  %v1472_v16 = vld [vmem:[%s1908_s5 + $0x1] ss:$0 sm:$0xff]  ;;  %v153_v21 = vld [vmem:[#allocation4 + $0x8] sm:$0xff]  ;;  %v270_v23 = vld [vmem:[#allocation4 + $0x38] sm:$0xff] }
  0x11   :  { %114 = vmatpush.msra.mxu1 %v91_v5  ;;  %v152_v22 = vld [vmem:[#allocation4] sm:$0xff]  ;;  %v269_v24 = vld [vmem:[#allocation4 + $0x30] sm:$0xff]  ;;  %v268_v25 = vld [vmem:[#allocation4 + $0x28] sm:$0xff] }
  0x12   :  { %145 = vmatpush.msra.mxu2 %v123_v13  ;;  %174 = vmatpush.msra.mxu3 %v154_v20  ;;  %v267_v26 = vld [vmem:[#allocation4 + $0x20] sm:$0xff]  ;;  %v186_v27 = vld [vmem:[#allocation4 + $0x78] sm:$0xff]  ;;  %v185_v28 = vld [vmem:[#allocation4 + $0x70] sm:$0xff] }
  0x13   :  { %115 = vmatpush.msra.mxu1 %v90_v6  ;;  %204 = vmatpush.msrb.mxu0 %v186_v27  ;;  %v1473_v29 = vld [vmem:[%s1908_s5 + $0x2] ss:$0 sm:$0xff]  ;;  %v382_v33 = vld [vmem:[#allocation4 + $0x58] sm:$0xff]  ;;  %v381_v34 = vld [vmem:[#allocation4 + $0x50] sm:$0xff] }
  0x14   :  { %146 = vmatpush.msra.mxu2 %v122_v14  ;;  %175 = vmatpush.msra.mxu3 %v153_v21  ;;  %v380_v35 = vld [vmem:[#allocation4 + $0x48] sm:$0xff]  ;;  %v379_v36 = vld [vmem:[#allocation4 + $0x40] sm:$0xff]  ;;  %v298_v39 = vld [vmem:[#allocation4 + $0x98] sm:$0xff] }
  0x15   :  { %205 = vmatpush.msrb.mxu0 %v185_v28  ;;  %v184_v37 = vld [vmem:[#allocation4 + $0x68] sm:$0xff]  ;;  %v183_v38 = vld [vmem:[#allocation4 + $0x60] sm:$0xff]  ;;  %v297_v40 = vld [vmem:[#allocation4 + $0x90] sm:$0xff] }
  0x16   :  { %176 = vmatpush.msra.mxu3 %v152_v22  ;;  %v296_v41 = vld [vmem:[#allocation4 + $0x88] sm:$0xff]  ;;  %v295_v42 = vld [vmem:[#allocation4 + $0x80] sm:$0xff]  ;;  %v217_v43 = vld [vmem:[#allocation4 + $0xd8] sm:$0xff] }
  0x17   :  { %206 = vmatpush.msrb.mxu0 %v184_v37  ;;  %v245_v44 = vld [vmem:[#allocation4 + $0x138] sm:$0xff]  ;;  %v216_v45 = vld [vmem:[#allocation4 + $0xd0] sm:$0xff]  ;;  %233 = vmatpush.msrb.mxu1 %v217_v43  ;;  %v1474_v46 = vld [vmem:[%s1908_s5 + $0x7] ss:$0 sm:$0xff] }
  0x18   :  { %285 = vmatpush.msrb.mxu3 %v270_v23  ;;  %258 = vmatpush.msrb.mxu2 %v245_v44  ;;  %v410_v50 = vld [vmem:[#allocation4 + $0xb8] sm:$0xff]  ;;  %v1475_v51 = vld [vmem:[%s1908_s5 + $0x8] ss:$0 sm:$0xff]  ;;  %v409_v52 = vld [vmem:[#allocation4 + $0xb0] sm:$0xff] }
  0x19   :  { %207 = vmatpush.msrb.mxu0 %v183_v38  ;;  %234 = vmatpush.msrb.mxu1 %v216_v45  ;;  %v408_v53 = vld [vmem:[#allocation4 + $0xa8] sm:$0xff]  ;;  %v407_v56 = vld [vmem:[#allocation4 + $0xa0] sm:$0xff]  ;;  %v244_v62 = vld [vmem:[#allocation4 + $0x130] sm:$0xff] }
  0x1a   :  { %286 = vmatpush.msrb.mxu3 %v269_v24  ;;  %v1476_v58 = vld [vmem:[%s1908_s5 + $0x9] ss:$0 sm:$0xff]  ;;  %259 = vmatpush.msrb.mxu2 %v244_v62  ;;  %v214_v1 = vld [vmem:[#allocation4 + $0xc0] sm:$0xff]  ;;  %v329_v4 = vld [vmem:[#allocation4 + $0xf8] sm:$0xff] }
  0x1b   :  { %316 = vmatpush.msra.mxu0 %v298_v39  ;;  %v215_v63 = vld [vmem:[#allocation4 + $0xc8] sm:$0xff]  ;;  %v242_v3 = vld [vmem:[#allocation4 + $0x120] sm:$0xff]  ;;  %v357_v5 = vld [vmem:[#allocation4 + $0x158] sm:$0xff] }
  0x1c   :  { %287 = vmatpush.msrb.mxu3 %v268_v25  ;;  %v243_v0 = vld [vmem:[#allocation4 + $0x128] sm:$0xff]  ;;  %235 = vmatpush.msrb.mxu1 %v215_v63  ;;  %v328_v6 = vld [vmem:[#allocation4 + $0xf0] sm:$0xff]  ;;  %v438_v25 = vld [vmem:[#allocation4 + $0x100] sm:$0xff] }
  0x1d   :  { %317 = vmatpush.msra.mxu0 %v297_v40  ;;  %260 = vmatpush.msrb.mxu2 %v243_v0  ;;  %v356_v7 = vld [vmem:[#allocation4 + $0x150] sm:$0xff]  ;;  %v1477_v12 = vld [vmem:[%s1908_s5 + $0xa] ss:$0 sm:$0xff]  ;;  %v1418_v28 = vld [vmem:[%s1905_s2 + $0x18] sm:$0xff] }
  0x1e   :  { %288 = vmatpush.msrb.mxu3 %v267_v26  ;;  %236 = vmatpush.msrb.mxu1 %v214_v1  ;;  %v468_v20 = vld [vmem:[#allocation4 + $0x170] sm:$0xff]  ;;  %v439_v21 = vld [vmem:[#allocation4 + $0x108] sm:$0xff]  ;;  %v466_v26 = vld [vmem:[#allocation4 + $0x160] sm:$0xff] }
  0x1f   :  { %318 = vmatpush.msra.mxu0 %v296_v41  ;;  %261 = vmatpush.msrb.mxu2 %v242_v3  ;;  %v467_v22 = vld [vmem:[#allocation4 + $0x168] sm:$0xff]  ;;  %v753_v37 = vld [vmem:[#allocation2 + $0x80] sm:$0xff]  ;;  %v654_v0 = vld [vmem:[#allocation2 + $0x58] sm:$0xff] }
  0x20   :  { %v586_v38 = vld [vmem:[%s1904_s1] sm:$0xff]  ;;  %v653_v3 = vld [vmem:[#allocation2 + $0x50] sm:$0xff] }
  0x21   :  { %319 = vmatpush.msra.mxu0 %v295_v42 }
  0x8c   :  { %v86_v9 = vpop.f32.mrf.mxu0 }
  0x8d   :  { %v87_v10 = vadd.f32 %v1471_v8, %v86_v9  ;;  %v327_v8 = vld [vmem:[#allocation4 + $0xe8] sm:$0xff] }
  0x8e   :  { %v355_v9 = vld [vmem:[#allocation4 + $0x148] sm:$0xff] }
  0x8f   :  { %v89_v11 = vmax.f32 %v87_v10, 0.0  ;;  %v326_v10 = vld [vmem:[#allocation4 + $0xe0] sm:$0xff] }
  0x91   :  { %1401 = vmatmul.msk.f32.vlgmr.msra.gmra.mxu1 %vm96_vm1, %v89_v11  ;;  %v354_v11 = vld [vmem:[#allocation4 + $0x140] sm:$0xff] }
  0x92   :  { %345 = vmatpush.msra.mxu1 %v329_v4  ;;  %v652_v4 = vld [vmem:[#allocation2 + $0x48] sm:$0xff] }
  0x94   :  { %346 = vmatpush.msra.mxu1 %v328_v6  ;;  %v787_v6 = vld [vmem:[#allocation2 + $0xb8] sm:$0xff] }
  0x96   :  { %347 = vmatpush.msra.mxu1 %v327_v8 }
  0x98   :  { %348 = vmatpush.msra.mxu1 %v326_v10  ;;  %v785_v10 = vld [vmem:[#allocation2 + $0xa8] sm:$0xff] }
 0x10e   :  { %v117_v17 = vpop.f32.mrf.mxu1 }
 0x10f   :  { %v118_v18 = vadd.f32 %v1472_v16, %v117_v17  ;;  %v441_v16 = vld [vmem:[#allocation4 + $0x118] sm:$0xff] }
 0x110   :  { %v469_v17 = vld [vmem:[#allocation4 + $0x178] sm:$0xff] }
 0x111   :  { %v120_v19 = vmax.f32 %v118_v18, 0.0  ;;  %v1478_v18 = vld [vmem:[%s1908_s5 + $0xb] ss:$0 sm:$0xff] }
 0x113   :  { %1402 = vmatmul.msk.f32.vlgmr.msra.gmra.mxu2 %vm96_vm1, %v120_v19  ;;  %v440_v19 = vld [vmem:[#allocation4 + $0x110] sm:$0xff] }
 0x114   :  { %370 = vmatpush.msra.mxu2 %v357_v5  ;;  %v651_v5 = vld [vmem:[#allocation2 + $0x40] sm:$0xff] }
 0x116   :  { %371 = vmatpush.msra.mxu2 %v356_v7  ;;  %v786_v7 = vld [vmem:[#allocation2 + $0xb0] sm:$0xff] }
 0x118   :  { %372 = vmatpush.msra.mxu2 %v355_v9 }
 0x11a   :  { %373 = vmatpush.msra.mxu2 %v354_v11 }
 0x196   :  { %v148_v30 = vpop.f32.mrf.mxu2 }
 0x197   :  { %v149_v31 = vadd.f32 %v1473_v29, %v148_v30  ;;  %v1479_v29 = vld [vmem:[%s1908_s5 + $0xc] ss:$0 sm:$0xff]  ;;  %v1417_v30 = vld [vmem:[%s1905_s2 + $0x10] sm:$0xff] }
 0x199   :  { %v151_v32 = vmax.f32 %v149_v31, 0.0 }
 0x19b   :  { %1403 = vmatmul.msk.f32.vlgmr.msra.gmra.mxu3 %vm96_vm1, %v151_v32 }
 0x19c   :  { %397 = vmatpush.msra.mxu3 %v382_v33 }
 0x19e   :  { %398 = vmatpush.msra.mxu3 %v381_v34  ;;  %v756_v34 = vld [vmem:[#allocation2 + $0x98] sm:$0xff] }
 0x1a0   :  { %399 = vmatpush.msra.mxu3 %v380_v35  ;;  %v755_v35 = vld [vmem:[#allocation2 + $0x90] sm:$0xff] }
 0x1a2   :  { %400 = vmatpush.msra.mxu3 %v379_v36  ;;  %v754_v36 = vld [vmem:[#allocation2 + $0x88] sm:$0xff] }
 0x1a3   :  { %1407 = vmatmul.msk.f32.vlgmr.msrb.gmra.mxu3 %vm96_vm1, %v151_v32 }
 0x1a4   :  { %672 = vmatpush.msrb.mxu3 %v654_v0  ;;  %v932_v0 = vld [vmem:[#allocation4 + $0x1b0] sm:$0xff] }
 0x1a6   :  { %673 = vmatpush.msrb.mxu3 %v653_v3 }
 0x1a8   :  { %674 = vmatpush.msrb.mxu3 %v652_v4 }
 0x1aa   :  { %675 = vmatpush.msrb.mxu3 %v651_v5  ;;  %v930_v5 = vld [vmem:[#allocation4 + $0x1a0] sm:$0xff] }
 0x1ab   :  { %1411 = vmatmul.msk.f32.vlgmr.msra.gmra.mxu3 %vm96_vm1, %v151_v32 }
 0x1ac   :  { %805 = vmatpush.msra.mxu3 %v787_v6 }
 0x1ae   :  { %806 = vmatpush.msra.mxu3 %v786_v7  ;;  %v1045_v7 = vld [vmem:[#allocation4 + $0x1d8] sm:$0xff] }
 0x1b0   :  { %807 = vmatpush.msra.mxu3 %v785_v10  ;;  %v1042_v10 = vld [vmem:[#allocation4 + $0x1c0] sm:$0xff] }
 0x21e   :  { %v178_v47 = vpop.f32.mrf.mxu3 }
 0x21f   :  { %v179_v48 = vadd.f32 %v1474_v46, %v178_v47 }
 0x221   :  { %v181_v49 = vmax.f32 %v179_v48, 0.0 }
 0x223   :  { %1404 = vmatmul.msk.f32.vlgmr.msrb.gmra.mxu0 %vm96_vm1, %v181_v49 }
 0x224   :  { %428 = vmatpush.msrb.mxu0 %v410_v50  ;;  %v1480_v50 = vld [vmem:[%s1908_s5 + $0x10] ss:$0 sm:$0xff] }
 0x226   :  { %v290_v54 = vpop.f32.mrf.mxu3  ;;  %429 = vmatpush.msrb.mxu0 %v409_v52 }
 0x227   :  { %v291_v55 = vadd.f32 %v1475_v51, %v290_v54 }
 0x228   :  { %430 = vmatpush.msrb.mxu0 %v408_v53 }
 0x229   :  { %v293_v57 = vmax.f32 %v291_v55, 0.0 }
 0x22a   :  { %431 = vmatpush.msrb.mxu0 %v407_v56 }
 0x22b   :  { %1408 = vmatmul.msk.f32.vlgmr.msra.gmra.mxu0 %vm96_vm1, %v293_v57 }
 0x22e   :  { %v402_v59 = vpop.f32.mrf.mxu3 }
 0x22f   :  { %v403_v60 = vadd.f32 %v1476_v58, %v402_v59 }
 0x231   :  { %v405_v61 = vmax.f32 %v403_v60, 0.0 }
 0x233   :  { %1412 = vmatmul.msk.f32.vlgmr.msrb.gmra.mxu0 %vm96_vm1, %v405_v61 }
 0x2a0   :  { %v209_v13 = vpop.f32.mrf.mxu0 }
 0x2a1   :  { %v210_v14 = vadd.f32 %v1477_v12, %v209_v13  ;;  %v784_v13 = vld [vmem:[#allocation2 + $0xa0] sm:$0xff] }
 0x2a2   :  { %808 = vmatpush.msra.mxu3 %v784_v13  ;;  %v847_v13 = vld [vmem:[#allocation4 + $0x1e8] sm:$0xff] }
 0x2a3   :  { %v212_v15 = vmax.f32 %v210_v14, 0.0 }
 0x2a5   :  { %1405 = vmatmul.msk.f32.vlgmr.msrb.gmra.mxu1 %vm96_vm1, %v212_v15  ;;  %1406 = vmatmul.msk.f32.vlgmr.msrb.gmra.mxu2 %vm96_vm1, %v212_v15  ;;  %v685_v15 = vld [vmem:[#allocation2 + $0x78] sm:$0xff] }
 0x2a6   :  { %457 = vmatpush.msrb.mxu1 %v441_v16  ;;  %482 = vmatpush.msrb.mxu2 %v469_v17  ;;  %v684_v16 = vld [vmem:[#allocation2 + $0x70] sm:$0xff] }
 0x2a7   :  { %703 = vmatpush.msra.mxu0 %v685_v15  ;;  %v961_v15 = vld [vmem:[#allocation4 + $0x218] sm:$0xff] }
 0x2a8   :  { %v321_v23 = vpop.f32.mrf.mxu0  ;;  %458 = vmatpush.msrb.mxu1 %v440_v19  ;;  %483 = vmatpush.msrb.mxu2 %v468_v20 }
 0x2a9   :  { %v322_v24 = vadd.f32 %v1478_v18, %v321_v23  ;;  %704 = vmatpush.msra.mxu0 %v684_v16  ;;  %v960_v16 = vld [vmem:[#allocation4 + $0x210] sm:$0xff] }
 0x2aa   :  { %459 = vmatpush.msrb.mxu1 %v439_v21  ;;  %484 = vmatpush.msrb.mxu2 %v467_v22 }
 0x2ab   :  { %v324_v27 = vmax.f32 %v322_v24, 0.0 }
 0x2ac   :  { %460 = vmatpush.msrb.mxu1 %v438_v25  ;;  %485 = vmatpush.msrb.mxu2 %v466_v26 }
 0x2ad   :  { %1409 = vmatmul.msk.f32.vlgmr.msra.gmra.mxu1 %vm96_vm1, %v324_v27  ;;  %1410 = vmatmul.msk.f32.vlgmr.msra.gmra.mxu2 %vm96_vm1, %v324_v27 }
 0x2ae   :  { %745 = vmatpush.msra.mxu1 %v1418_v28  ;;  %774 = vmatpush.msra.mxu2 %v756_v34 }
 0x2b0   :  { %v433_v31 = vpop.f32.mrf.mxu0  ;;  %746 = vmatpush.msra.mxu1 %v1417_v30  ;;  %775 = vmatpush.msra.mxu2 %v755_v35 }
 0x2b1   :  { %v434_v32 = vadd.f32 %v1479_v29, %v433_v31 }
 0x2b2   :  { %776 = vmatpush.msra.mxu2 %v754_v36 }
 0x2b3   :  { %v436_v33 = vmax.f32 %v434_v32, 0.0 }
 0x2b4   :  { %777 = vmatpush.msra.mxu2 %v753_v37 }
 0x2b5   :  { %1413 = vmatmul.msk.f32.vlgmr.msrb.gmra.mxu1 %vm96_vm1, %v436_v33  ;;  %1414 = vmatmul.msk.f32.vlgmr.msrb.gmra.mxu2 %vm96_vm1, %v436_v33 }
 0x2bd   :  { %1420 = vmatmul.msk.f32.vlgmr.msra.gmra.mxu1 %vm65_vm0, %v1648_v2 }
 0x322   :  { %v238_v39 = vpop.f32.mrf.mxu1 }
 0x323   :  { %v587_v40 = vmul.f32 %v586_v38, %v238_v39  ;;  %v1481_v39 = vld [vmem:[%s1908_s5 + $0x11] ss:$0 sm:$0xff] }
 0x325   :  { %v588_v41 = vsel %vm96_vm1, %v587_v40, 0.0 }
 0x326   :  { %589 = vadd.xlane.f32.xlu0 %v588_v41 }
 0x328   :  { %v1706_v44 = vpop.f32.mrf.mxu2 }
 0x329   :  { %v490_v45 = vmul.f32 %v1706_v44, %v1706_v44 }
 0x32a   :  { %v350_v42 = vpop.f32.mrf.mxu1 }
 0x32b   :  { %v591_v43 = vmul.f32 %v586_v38, %v350_v42  ;;  %v491_v48 = vsel %vm96_vm1, %v490_v45, 0.0 }
 0x32d   :  { %v592_v2 = vsel %vm96_vm1, %v591_v43, 0.0 }
 0x32e   :  { %593 = vadd.xlane.f32.xlu0 %v592_v2 }
 0x330   :  { %v1716_v17 = vpop.f32.mrf.mxu2 }
 0x332   :  { %v462_v46 = vpop.f32.mrf.mxu1 }
 0x333   :  { %v595_v47 = vmul.f32 %v586_v38, %v462_v46 }
 0x335   :  { %v596_v49 = vsel %vm96_vm1, %v595_v47, 0.0 }
 0x336   :  { %492 = vadd.xlane.f32.xlu0 %v491_v48  ;;  %597 = vadd.xlane.f32.xlu1 %v596_v49 }
 0x338   :  { %v1718_v25 = vpop.f32.mrf.mxu2 }
 0x33a   :  { %v748_v51 = vpop.f32.mrf.mxu1 }
 0x33b   :  { %v749_v52 = vadd.f32 %v1480_v50, %v748_v51 }
 0x33d   :  { %v751_v53 = vmax.f32 %v749_v52, 0.0  ;;  %v683_v52 = vld [vmem:[#allocation2 + $0x68] sm:$0xff] }
 0x33e   :  { %705 = vmatpush.msra.mxu0 %v683_v52  ;;  %v1018_v52 = vld [vmem:[#allocation4 + $0x2c8] sm:$0xff] }
 0x33f   :  { %1422 = vmatmul.msk.f32.vlgmr.msra.gmra.mxu2 %vm96_vm1, %v751_v53  ;;  %v682_v53 = vld [vmem:[#allocation2 + $0x60] sm:$0xff] }
 0x340   :  { %706 = vmatpush.msra.mxu0 %v682_v53  ;;  %v989_v53 = vld [vmem:[#allocation4 + $0x260] sm:$0xff] }
 0x399   :  { %v590_v54 = vpop.xlane.xlu0 %589 }
 0x3a1   :  { %v594_v55 = vpop.xlane.xlu0 %593 }
 0x3a2   :  { %v599_v56 = vmax.f32 %v590_v54, %v594_v55 }
 0x3a9   :  { %v598_v57 = vpop.xlane.xlu1 %597 }
 0x3aa   :  { %v600_v58 = vmax.f32 %v599_v56, %v598_v57  ;;  %v816_v56 = vld [vmem:[#allocation4 + $0x188] sm:$0xff] }
 0x3ac   :  { %v601_v59 = vsub.f32 %v590_v54, %v600_v58  ;;  %v604_v60 = vsub.f32 %v594_v55, %v600_v58  ;;  %v607_v61 = vsub.f32 %v598_v57, %v600_v58  ;;  %v818_v54 = vld [vmem:[#allocation4 + $0x198] sm:$0xff]  ;;  %v817_v55 = vld [vmem:[#allocation4 + $0x190] sm:$0xff]  ;;  %v815_v57 = vld [vmem:[#allocation4 + $0x180] sm:$0xff] }
 0x3ad   :  { %836 = vmatpush.msrb.mxu0 %v818_v54  ;;  %v1482_v58 = vld [vmem:[%s1908_s5 + $0x3] ss:$0 sm:$0xff] }
 0x3ae   :  { %v602_v62 = vmul.f32 1.442695, %v601_v59  ;;  %v605_v63 = vmul.f32 1.442695, %v604_v60  ;;  %v608_v1 = vmul.f32 1.442695, %v607_v61 }
 0x3af   :  { %837 = vmatpush.msrb.mxu0 %v817_v55  ;;  %v1017_v54 = vld [vmem:[#allocation4 + $0x2c0] sm:$0xff]  ;;  %v1488_v55 = vld [vmem:[%s1908_s5 + $0x1a] ss:$0 sm:$0xff] }
 0x3b0   :  { %1497 = vpow2.f32 %v602_v62  ;;  %v933_v62 = vld [vmem:[#allocation4 + $0x1b8] sm:$0xff] }
 0x3b1   :  { %1499 = vpow2.f32 %v605_v63  ;;  %838 = vmatpush.msrb.mxu0 %v816_v56  ;;  %v1483_v63 = vld [vmem:[%s1908_s5 + $0x12] ss:$0 sm:$0xff] }
 0x3b2   :  { %1501 = vpow2.f32 %v608_v1  ;;  %v931_v1 = vld [vmem:[#allocation4 + $0x1a8] sm:$0xff] }
 0x3b3   :  { %839 = vmatpush.msrb.mxu0 %v815_v57 }
 0x3b6   :  { %v1498_v8 = vpop.eup %1497 }
 0x3b7   :  { %v1500_v9 = vpop.eup %1499 }
 0x3b8   :  { %v610_v11 = vadd.f32 %v1500_v9, %v1498_v8  ;;  %v1502_v12 = vpop.eup %1501 }
 0x3ba   :  { %v611_v14 = vadd.f32 %v1502_v12, %v610_v11  ;;  %v849_v11 = vld [vmem:[#allocation4 + $0x1f8] sm:$0xff] }
 0x3bb   :  { %867 = vmatpush.msrb.mxu1 %v849_v11 }
 0x3bc   :  { %1503 = vrcp.f32 %v611_v14  ;;  %v623_v21 = vand.u32 2147483648, %v611_v14  ;;  %v621_v23 = vand.u32 2147483647, %v611_v14  ;;  %vm617_vm3 = vweird.f32 %v611_v14 }
 0x3be   :  { %v624_v26 = vor.u32 1.1754944e-38, %v623_v21  ;;  %vm622_vm5 = vcmp.eq.f32.partialorder %v621_v23, 8.507059e+37  ;;  %v908_v21 = vld [vmem:[#allocation4 + $0x2b8] sm:$0xff] }
 0x3c2   :  { %v1504_v18 = vpop.eup %1503  ;;  %v779_v40 = vpop.f32.mrf.mxu2 }
 0x3c3   :  { %v613_v19 = vmul.f32 %v1504_v18, %v611_v14  ;;  %vm618_vm2 = vweird.f32 %v1504_v18  ;;  %v780_v42 = vadd.f32 %v1481_v39, %v779_v40  ;;  %v846_v14 = vld [vmem:[#allocation4 + $0x1e0] sm:$0xff] }
 0x3c4   :  { %vm619_vm4 = vmor %vm617_vm3, %vm618_vm2 }
 0x3c5   :  { %v614_v20 = vsub.f32 1.0, %v613_v19  ;;  %v782_v47 = vmax.f32 %v780_v42, 0.0  ;;  %v958_v19 = vld [vmem:[#allocation4 + $0x200] sm:$0xff]  ;;  %v878_v42 = vld [vmem:[#allocation4 + $0x248] sm:$0xff] }
 0x3c7   :  { %v615_v22 = vmul.f32 %v1504_v18, %v614_v20  ;;  %v880_v20 = vld [vmem:[#allocation4 + $0x258] sm:$0xff] }
 0x3c8   :  { %896 = vmatpush.msrb.mxu2 %v880_v20  ;;  %v506_v20 = vmul.f32 %v1716_v17, %v1716_v17 }
 0x3c9   :  { %v616_v24 = vadd.f32 %v1504_v18, %v615_v22  ;;  %v879_v22 = vld [vmem:[#allocation4 + $0x250] sm:$0xff] }
 0x3ca   :  { %897 = vmatpush.msrb.mxu2 %v879_v22 }
 0x3cb   :  { %v620_v27 = vsel %vm619_vm4, %v1504_v18, %v616_v24  ;;  %v959_v18 = vld [vmem:[#allocation4 + $0x208] sm:$0xff]  ;;  %v1485_v24 = vld [vmem:[%s1908_s5 + $0x17] ss:$0 sm:$0xff] }
 0x3cc   :  { %v625_v28 = vsel %vm622_vm5, %v624_v26, %v620_v27  ;;  %898 = vmatpush.msrb.mxu2 %v878_v42 }
 0x3cd   :  { %v626_v29 = vmul.f32 %v1498_v8, %v625_v28  ;;  %v627_v30 = vmul.f32 %v1500_v9, %v625_v28  ;;  %v628_v31 = vmul.f32 %v1502_v12, %v625_v28  ;;  %v1044_v8 = vld [vmem:[#allocation4 + $0x1d0] sm:$0xff]  ;;  %v1043_v9 = vld [vmem:[#allocation4 + $0x1c8] sm:$0xff] }
 0x3ce   :  { %v848_v12 = vld [vmem:[#allocation4 + $0x1f0] sm:$0xff] }
 0x3cf   :  { %v629_v32 = vmul.f32 %v626_v29, %v1706_v44  ;;  %v633_v33 = vmul.f32 %v627_v30, %v1716_v17  ;;  %v630_v34 = vadd.f32 1e-06, %v626_v29  ;;  %v635_v35 = vadd.f32 1e-06, %v627_v30  ;;  %868 = vmatpush.msrb.mxu1 %v848_v12  ;;  %v1073_v29 = vld [vmem:[#allocation4 + $0x238] sm:$0xff]  ;;  %v1443_v12 = vld [vmem:[%s1904_s1 + $0x8] sm:$0xff] }
 0x3d0   :  { %v641_v36 = vadd.f32 1e-06, %v628_v31  ;;  %v639_v37 = vmul.f32 %v628_v31, %v1718_v25  ;;  %v1486_v30 = vld [vmem:[%s1908_s5 + $0x18] ss:$0 sm:$0xff]  ;;  %v1072_v31 = vld [vmem:[#allocation4 + $0x230] sm:$0xff] }
 0x3d1   :  { %v634_v38 = vadd.f32 %v633_v33, %v629_v32  ;;  %1505 = vlog2.f32 %v630_v34  ;;  %869 = vmatpush.msrb.mxu1 %v847_v13  ;;  %v1071_v32 = vld [vmem:[#allocation4 + $0x228] sm:$0xff] }
 0x3d2   :  { %1507 = vlog2.f32 %v635_v35  ;;  %v1070_v35 = vld [vmem:[#allocation4 + $0x220] sm:$0xff] }
 0x3d3   :  { %v640_v41 = vadd.f32 %v639_v37, %v634_v38  ;;  %1509 = vlog2.f32 %v641_v36  ;;  %870 = vmatpush.msrb.mxu1 %v846_v14  ;;  %v1487_v37 = vld [vmem:[%s1908_s5 + $0x19] ss:$0 sm:$0xff] }
 0x3d5   :  { %1415 = vmatmul.msk.f32.vlgmr.msrb.gmra.mxu3 %vm96_vm1, %v640_v41  ;;  %979 = vmatpush.msra.mxu1 %v961_v15  ;;  %v907_v41 = vld [vmem:[#allocation4 + $0x2b0] sm:$0xff] }
 0x3d6   :  { %921 = vmatpush.msrb.mxu3 %v908_v21 }
 0x3d7   :  { %v1506_v43 = vpop.eup %1505  ;;  %980 = vmatpush.msra.mxu1 %v960_v16 }
 0x3d8   :  { %v1508_v2 = vpop.eup %1507  ;;  %v632_v45 = vmul.f32 0.6931472, %v1506_v43  ;;  %922 = vmatpush.msrb.mxu3 %v907_v41  ;;  %v906_v43 = vld [vmem:[#allocation4 + $0x2a8] sm:$0xff] }
 0x3d9   :  { %v1510_v46 = vpop.eup %1509  ;;  %v637_v48 = vmul.f32 0.6931472, %v1508_v2  ;;  %981 = vmatpush.msra.mxu1 %v959_v18  ;;  %v877_v2 = vld [vmem:[#allocation4 + $0x240] sm:$0xff] }
 0x3da   :  { %v643_v50 = vmul.f32 0.6931472, %v1510_v46  ;;  %923 = vmatpush.msrb.mxu3 %v906_v43  ;;  %899 = vmatpush.msrb.mxu2 %v877_v2  ;;  %v992_v46 = vld [vmem:[#allocation4 + $0x278] sm:$0xff] }
 0x3db   :  { %v638_v49 = vadd.f32 %v637_v48, %v632_v45  ;;  %982 = vmatpush.msra.mxu1 %v958_v19  ;;  %v905_v45 = vld [vmem:[#allocation4 + $0x2a0] sm:$0xff]  ;;  %v991_v48 = vld [vmem:[#allocation4 + $0x270] sm:$0xff] }
 0x3dc   :  { %924 = vmatpush.msrb.mxu3 %v905_v45  ;;  %1008 = vmatpush.msra.mxu2 %v992_v46 }
 0x3dd   :  { %1424 = vmatmul.msk.f32.vlgmr.msra.gmra.mxu3 %vm96_vm1, %v782_v47  ;;  %v1728_v51 = vadd.f32 %v643_v50, %v638_v49  ;;  %v1020_v47 = vld [vmem:[#allocation4 + $0x2d8] sm:$0xff]  ;;  %v1019_v49 = vld [vmem:[#allocation4 + $0x2d0] sm:$0xff]  ;;  %v990_v50 = vld [vmem:[#allocation4 + $0x268] sm:$0xff] }
 0x3de   :  { %1033 = vmatpush.msra.mxu3 %v1020_v47  ;;  %1009 = vmatpush.msra.mxu2 %v991_v48 }
 0x3e0   :  { %1034 = vmatpush.msra.mxu3 %v1019_v49  ;;  %1010 = vmatpush.msra.mxu2 %v990_v50 }
 0x3e2   :  { %1035 = vmatpush.msra.mxu3 %v1018_v52  ;;  %1011 = vmatpush.msra.mxu2 %v989_v53 }
 0x3e4   :  { %1036 = vmatpush.msra.mxu3 %v1017_v54 }
 0x458   :  { %v677_v59 = vpop.f32.mrf.mxu3 }
 0x459   :  { %v678_v60 = vadd.f32 %v1482_v58, %v677_v59  ;;  %v1104_v59 = vld [vmem:[#allocation4 + $0x298] sm:$0xff] }
 0x45b   :  { %v680_v61 = vmax.f32 %v678_v60, 0.0  ;;  %v1132_v60 = vld [vmem:[#allocation4 + $0x2f8] sm:$0xff] }
 0x45d   :  { %1416 = vmatmul.msk.f32.vlgmr.msra.gmra.mxu0 %vm96_vm1, %v680_v61  ;;  %v1489_v61 = vld [vmem:[%s1908_s5 + $0x1b] ss:$0 sm:$0xff] }
 0x45e   :  { %948 = vmatpush.msra.mxu0 %v933_v62  ;;  %v1103_v62 = vld [vmem:[#allocation4 + $0x290] sm:$0xff] }
 0x460   :  { %v810_v3 = vpop.f32.mrf.mxu3  ;;  %949 = vmatpush.msra.mxu0 %v932_v0  ;;  %v1102_v0 = vld [vmem:[#allocation4 + $0x288] sm:$0xff] }
 0x461   :  { %v811_v4 = vadd.f32 %v1483_v63, %v810_v3  ;;  %v1131_v63 = vld [vmem:[#allocation4 + $0x2f0] sm:$0xff] }
 0x462   :  { %950 = vmatpush.msra.mxu0 %v931_v1  ;;  %v1130_v1 = vld [vmem:[#allocation4 + $0x2e8] sm:$0xff] }
 0x463   :  { %v813_v6 = vmax.f32 %v811_v4, 0.0 }
 0x464   :  { %951 = vmatpush.msra.mxu0 %v930_v5  ;;  %v1101_v5 = vld [vmem:[#allocation4 + $0x280] sm:$0xff] }
 0x465   :  { %1426 = vmatmul.msk.f32.vlgmr.msrb.gmra.mxu0 %vm96_vm1, %v813_v6 }
 0x466   :  { %1060 = vmatpush.msrb.mxu0 %v1045_v7 }
 0x468   :  { %1061 = vmatpush.msrb.mxu0 %v1044_v8  ;;  %v1490_v8 = vld [vmem:[%s1908_s5 + $0x1c] ss:$0 sm:$0xff] }
 0x46a   :  { %1062 = vmatpush.msrb.mxu0 %v1043_v9 }
 0x46c   :  { %1063 = vmatpush.msrb.mxu0 %v1042_v10 }
 0x46d   :  { %1432 = vmatmul.msk.f32.vlgmr.msra.gmra.mxu0 %vm96_vm1, %v813_v6 }
 0x475   :  { %1438 = vmatmul.msk.f32.vlgmr.msrb.gmra.mxu0 %vm96_vm1, %v813_v6  ;;  %v1129_v6 = vld [vmem:[#allocation4 + $0x2e0] sm:$0xff] }
 0x4da   :  { %v1740_v23 = vpop.f32.mrf.mxu0 }
 0x4e2   :  { %v841_v26 = vpop.f32.mrf.mxu0 }
 0x4e3   :  { %v842_v27 = vadd.f32 %v1485_v24, %v841_v26  ;;  %v507_v24 = vsel %vm96_vm1, %v506_v20, 0.0 }
 0x4e5   :  { %v844_v28 = vmax.f32 %v842_v27, 0.0 }
 0x4e7   :  { %1428 = vmatmul.msk.f32.vlgmr.msrb.gmra.mxu1 %vm96_vm1, %v844_v28 }
 0x4e8   :  { %1091 = vmatpush.msrb.mxu1 %v1073_v29 }
 0x4ea   :  { %v953_v33 = vpop.f32.mrf.mxu0  ;;  %1092 = vmatpush.msrb.mxu1 %v1072_v31 }
 0x4eb   :  { %v954_v34 = vadd.f32 %v1486_v30, %v953_v33  ;;  %v522_v33 = vmul.f32 %v1718_v25, %v1718_v25 }
 0x4ec   :  { %1093 = vmatpush.msrb.mxu1 %v1071_v32 }
 0x4ed   :  { %v956_v36 = vmax.f32 %v954_v34, 0.0  ;;  %v523_v34 = vsel %vm96_vm1, %v522_v33, 0.0 }
 0x4ee   :  { %1094 = vmatpush.msrb.mxu1 %v1070_v35 }
 0x4ef   :  { %1434 = vmatmul.msk.f32.vlgmr.msra.gmra.mxu1 %vm96_vm1, %v956_v36 }
 0x4f2   :  { %v1065_v38 = vpop.f32.mrf.mxu0 }
 0x4f3   :  { %v1066_v39 = vadd.f32 %v1487_v37, %v1065_v38  ;;  %v493_v38 = vpop.xlane.xlu0 %492 }
 0x4f5   :  { %v1068_v40 = vmax.f32 %v1066_v39, 0.0  ;;  %v494_v39 = vmax.f32 %v493_v38, 1e-24 }
 0x4f7   :  { %1440 = vmatmul.msk.f32.vlgmr.msrb.gmra.mxu1 %vm96_vm1, %v1068_v40  ;;  %1511 = vrsqrt.f32 %v494_v39  ;;  %vm501_vm7 = vweird.f32 %v494_v39 }
 0x4fd   :  { %v1796_v42 = vpop.eup %1511 }
 0x4fe   :  { %v496_v2 = vmul.f32 %v1796_v42, %v494_v39  ;;  %vm502_vm6 = vweird.f32 %v1796_v42 }
 0x4ff   :  { %vm1813_vm8 = vmor %vm501_vm7, %vm502_vm6 }
 0x500   :  { %v497_v47 = vmul.f32 %v1796_v42, %v496_v2 }
 0x502   :  { %v498_v50 = vmul.f32 0.5, %v497_v47 }
 0x564   :  { %v872_v56 = vpop.f32.mrf.mxu1 }
 0x565   :  { %v873_v57 = vadd.f32 %v1488_v55, %v872_v56 }
 0x567   :  { %v875_v58 = vmax.f32 %v873_v57, 0.0  ;;  %v499_v57 = vsub.f32 1.5, %v498_v50 }
 0x569   :  { %1429 = vmatmul.msk.f32.vlgmr.msrb.gmra.mxu2 %vm96_vm1, %v875_v58  ;;  %1430 = vmatmul.msk.f32.vlgmr.msrb.gmra.mxu3 %vm96_vm1, %v875_v58 }
 0x56a   :  { %1120 = vmatpush.msrb.mxu2 %v1104_v59  ;;  %1145 = vmatpush.msrb.mxu3 %v1132_v60 }
 0x56c   :  { %v984_v3 = vpop.f32.mrf.mxu1  ;;  %1121 = vmatpush.msrb.mxu2 %v1103_v62  ;;  %1146 = vmatpush.msrb.mxu3 %v1131_v63 }
 0x56d   :  { %v985_v4 = vadd.f32 %v1489_v61, %v984_v3  ;;  %v56_v61 = vlaneseq }
 0x56e   :  { %1122 = vmatpush.msrb.mxu2 %v1102_v0  ;;  %1147 = vmatpush.msrb.mxu3 %v1130_v1 }
 0x56f   :  { %v987_v7 = vmax.f32 %v985_v4, 0.0  ;;  %v500_v4 = vmul.f32 %v1796_v42, %v499_v57 }
 0x570   :  { %1123 = vmatpush.msrb.mxu2 %v1101_v5  ;;  %1148 = vmatpush.msrb.mxu3 %v1129_v6 }
 0x571   :  { %1435 = vmatmul.msk.f32.vlgmr.msra.gmra.mxu2 %vm96_vm1, %v987_v7  ;;  %1436 = vmatmul.msk.f32.vlgmr.msra.gmra.mxu3 %vm96_vm1, %v987_v7  ;;  %v1318_v7 = vld [vmem:[#allocation2 + $0xd8] sm:$0xff] }
 0x572   :  { %1336 = vmatpush.msra.mxu0 %v1318_v7 }
 0x574   :  { %v1096_v9 = vpop.f32.mrf.mxu1 }
 0x575   :  { %v1097_v10 = vadd.f32 %v1490_v8, %v1096_v9 }
 0x577   :  { %v1099_v11 = vmax.f32 %v1097_v10, 0.0  ;;  %v1317_v10 = vld [vmem:[#allocation2 + $0xd0] sm:$0xff] }
 0x578   :  { %1337 = vmatpush.msra.mxu0 %v1317_v10 }
 0x579   :  { %1441 = vmatmul.msk.f32.vlgmr.msrb.gmra.mxu2 %vm96_vm1, %v1099_v11  ;;  %1442 = vmatmul.msk.f32.vlgmr.msrb.gmra.mxu3 %vm96_vm1, %v1099_v11 }
 0x5ec   :  { %v901_v13 = vpop.f32.mrf.mxu2  ;;  %v1772_v14 = vpop.f32.mrf.mxu3 }
 0x5ed   :  { %v1251_v15 = vmul.f32 %v1443_v12, %v901_v13  ;;  %v1153_v16 = vmul.f32 %v1772_v14, %v1772_v14  ;;  %v1316_v13 = vld [vmem:[#allocation2 + $0xc8] sm:$0xff] }
 0x5ee   :  { %1338 = vmatpush.msra.mxu0 %v1316_v13 }
 0x5ef   :  { %v1154_v18 = vsel %vm96_vm1, %v1153_v16, 0.0  ;;  %v1252_v19 = vsel %vm96_vm1, %v1251_v15, 0.0 }
 0x5f0   :  { %1155 = vadd.xlane.f32.xlu0 %v1154_v18  ;;  %1253 = vadd.xlane.f32.xlu1 %v1252_v19 }
 0x5f4   :  { %v1013_v21 = vpop.f32.mrf.mxu2  ;;  %v1782_v27 = vpop.f32.mrf.mxu3 }
 0x5f5   :  { %v1255_v22 = vmul.f32 %v1443_v12, %v1013_v21  ;;  %v1169_v28 = vmul.f32 %v1782_v27, %v1782_v27  ;;  %v504_v21 = vsel %vm1813_vm8, %v1796_v42, %v500_v4 }
 0x5f7   :  { %v1256_v26 = vsel %vm96_vm1, %v1255_v22, 0.0  ;;  %v1170_v31 = vsel %vm96_vm1, %v1169_v28, 0.0  ;;  %v1315_v22 = vld [vmem:[#allocation2 + $0xc0] sm:$0xff] }
 0x5f8   :  { %508 = vadd.xlane.f32.xlu1 %v507_v24  ;;  %1257 = vadd.xlane.f32.xlu2 %v1256_v26 }
 0x5f9   :  { %1339 = vmatpush.msra.mxu0 %v1315_v22 }
 0x5fc   :  { %v1125_v29 = vpop.f32.mrf.mxu2  ;;  %v1791_v35 = vpop.f32.mrf.mxu3 }
 0x5fd   :  { %v1259_v30 = vmul.f32 %v1443_v12, %v1125_v29  ;;  %v1185_v36 = vmul.f32 %v1791_v35, %v1791_v35  ;;  %v57_v12 = vshrl.u32 %v56_v61, 7 }
 0x5ff   :  { %v1260_v32 = vsel %vm96_vm1, %v1259_v30, 0.0  ;;  %v1186_v37 = vsel %vm96_vm1, %v1185_v36, 0.0  ;;  %vm58_vm12 = vcmp.lt.s32.totalorder %v57_v12, 2 }
 0x600   :  { %1171 = vadd.xlane.f32.xlu1 %v1170_v31  ;;  %1261 = vadd.xlane.f32.xlu2 %v1260_v32  ;;  %v505_v32 = vmul.f32 %v504_v21, %v1706_v44 }
 0x608   :  { %524 = vadd.xlane.f32.xlu2 %v523_v34 }
 0x610   :  { %1187 = vadd.xlane.f32.xlu2 %v1186_v37  ;;  %v1595_v37 = vmov 0.0  }
 0x611   :  { %v1827_v38 = vsel %vm58_vm12, 1.0, %v1595_v37 }
 0x663   :  { %v1156_v40 = vpop.xlane.xlu0 %1155  ;;  %v1254_v41 = vpop.xlane.xlu1 %1253 }
 0x664   :  { %v1798_v43 = vmax.f32 %v1156_v40, 1e-24 }
 0x666   :  { %1513 = vrsqrt.f32 %v1798_v43  ;;  %vm1164_vm14 = vweird.f32 %v1798_v43 }
 0x66b   :  { %v509_v45 = vpop.xlane.xlu1 %508  ;;  %v1258_v46 = vpop.xlane.xlu2 %1257 }
 0x66c   :  { %v510_v48 = vmax.f32 %v509_v45, 1e-24  ;;  %v1803_v49 = vpop.eup %1513  ;;  %v1263_v53 = vmax.f32 %v1254_v41, %v1258_v46 }
 0x66d   :  { %v1159_v52 = vmul.f32 %v1803_v49, %v1798_v43  ;;  %vm1165_vm13 = vweird.f32 %v1803_v49 }
 0x66e   :  { %1515 = vrsqrt.f32 %v510_v48  ;;  %vm517_vm10 = vweird.f32 %v510_v48  ;;  %vm1166_vm0 = vmor %vm1164_vm14, %vm1165_vm13 }
 0x66f   :  { %v1160_v62 = vmul.f32 %v1803_v49, %v1159_v52 }
 0x671   :  { %v1161_v11 = vmul.f32 0.5, %v1160_v62 }
 0x673   :  { %v1172_v54 = vpop.xlane.xlu1 %1171  ;;  %v1262_v55 = vpop.xlane.xlu2 %1261  ;;  %v1162_v28 = vsub.f32 1.5, %v1161_v11 }
 0x674   :  { %v1516_v56 = vpop.eup %1515  ;;  %v1807_v58 = vmax.f32 %v1172_v54, 1e-24  ;;  %v1264_v59 = vmax.f32 %v1263_v53, %v1262_v55 }
 0x675   :  { %v512_v60 = vmul.f32 %v1516_v56, %v510_v48  ;;  %vm518_vm9 = vweird.f32 %v1516_v56  ;;  %v1163_v39 = vmul.f32 %v1803_v49, %v1162_v28 }
 0x676   :  { %1517 = vrsqrt.f32 %v1807_v58  ;;  %v1265_v63 = vsub.f32 %v1254_v41, %v1264_v59  ;;  %v1268_v0 = vsub.f32 %v1258_v46, %v1264_v59  ;;  %v1271_v3 = vsub.f32 %v1262_v55, %v1264_v59  ;;  %vm519_vm11 = vmor %vm517_vm10, %vm518_vm9 }
 0x677   :  { %v513_v1 = vmul.f32 %v1516_v56, %v512_v60  ;;  %vm1180_vm2 = vweird.f32 %v1807_v58  ;;  %v1167_v52 = vsel %vm1166_vm0, %v1803_v49, %v1163_v39  ;;  %vm723_vm0 = vcmask 23568  }
 0x678   :  { %v1266_v5 = vmul.f32 1.442695, %v1265_v63  ;;  %v1269_v6 = vmul.f32 1.442695, %v1268_v0  ;;  %v1272_v9 = vmul.f32 1.442695, %v1271_v3 }
 0x679   :  { %v514_v8 = vmul.f32 0.5, %v513_v1 }
 0x67a   :  { %1519 = vpow2.f32 %v1266_v5 }
 0x67b   :  { %v515_v16 = vsub.f32 1.5, %v514_v8  ;;  %1521 = vpow2.f32 %v1269_v6  ;;  %v525_v18 = vpop.xlane.xlu2 %524 }
 0x67c   :  { %v1518_v19 = vpop.eup %1517  ;;  %v526_v20 = vmax.f32 %v525_v18, 1e-24  ;;  %1523 = vpow2.f32 %v1272_v9 }
 0x67d   :  { %v516_v24 = vmul.f32 %v1516_v56, %v515_v16  ;;  %v1175_v26 = vmul.f32 %v1518_v19, %v1807_v58  ;;  %vm1181_vm15 = vweird.f32 %v1518_v19 }
 0x67e   :  { %1525 = vrsqrt.f32 %v526_v20  ;;  %vm1182_vm3 = vmor %vm1180_vm2, %vm1181_vm15  ;;  %vm533_vm5 = vweird.f32 %v526_v20  ;;  %vm721_vm15 = vcmask 7168   ;;  %vm1389_vm2 = vcmask 15368  }
 0x67f   :  { %v1176_v29 = vmul.f32 %v1518_v19, %v1175_v26  ;;  %v520_v30 = vsel %vm519_vm11, %v1516_v56, %v516_v24  ;;  %v1168_v56 = vmul.f32 %v1167_v52, %v1772_v14 }
 0x680   :  { %v1821_v31 = vpop.eup %1519  ;;  %v521_v33 = vmul.f32 %v520_v30, %v1716_v17 }
 0x681   :  { %v1825_v34 = vpop.eup %1521  ;;  %v1177_v36 = vmul.f32 0.5, %v1176_v29 }
 0x682   :  { %v1274_v40 = vadd.f32 %v1825_v34, %v1821_v31  ;;  %v538_v41 = vmul.f32 %v521_v33, %v505_v32  ;;  %v1833_v42 = vpop.eup %1523 }
 0x683   :  { %v1178_v44 = vsub.f32 1.5, %v1177_v36  ;;  %v1188_v17 = vpop.xlane.xlu2 %1187 }
 0x684   :  { %v1526_v2 = vpop.eup %1525  ;;  %v1275_v45 = vadd.f32 %v1833_v42, %v1274_v40  ;;  %v1189_v46 = vmax.f32 %v1188_v17, 1e-24  ;;  %v539_v47 = vmul.f32 %v1827_v38, %v538_v41 }
 0x685   :  { %v1179_v48 = vmul.f32 %v1518_v19, %v1178_v44  ;;  %v528_v50 = vmul.f32 %v1526_v2, %v526_v20  ;;  %vm534_vm4 = vweird.f32 %v1526_v2 }
 0x686   :  { %1527 = vrcp.f32 %v1275_v45  ;;  %v540_v43 = vsel %vm96_vm1, %v539_v47, 0.0  ;;  %vm535_vm6 = vmor %vm533_vm5, %vm534_vm4  ;;  %v1287_v3 = vand.u32 2147483648, %v1275_v45  ;;  %v1285_v9 = vand.u32 2147483647, %v1275_v45 }
 0x687   :  { %v529_v53 = vmul.f32 %v1526_v2, %v528_v50  ;;  %1529 = vrsqrt.f32 %v1189_v46  ;;  %541 = vadd.xlane.f32.xlu0 %v540_v43  ;;  %v1183_v54 = vsel %vm1182_vm3, %v1518_v19, %v1179_v48  ;;  %vm1281_vm8 = vweird.f32 %v1275_v45 }
 0x688   :  { %v1184_v57 = vmul.f32 %v1183_v54, %v1782_v27  ;;  %v1288_v15 = vor.u32 1.1754944e-38, %v1287_v3  ;;  %vm1286_vm11 = vcmp.eq.f32.partialorder %v1285_v9, 8.507059e+37  ;;  %vm1196_vm12 = vweird.f32 %v1189_v46 }
 0x689   :  { %v530_v55 = vmul.f32 0.5, %v529_v53  ;;  %vm1391_vm3 = vcmask 31768  }
 0x68a   :  { %v1201_v60 = vmul.f32 %v1184_v57, %v1168_v56 }
 0x68b   :  { %v531_v59 = vsub.f32 1.5, %v530_v55 }
 0x68c   :  { %v1528_v61 = vpop.eup %1527  ;;  %v1202_v49 = vmul.f32 %v1827_v38, %v1201_v60 }
 0x68d   :  { %v1530_v58 = vpop.eup %1529  ;;  %v1277_v62 = vmul.f32 %v1528_v61, %v1275_v45  ;;  %v532_v63 = vmul.f32 %v1526_v2, %v531_v59  ;;  %vm1282_vm7 = vweird.f32 %v1528_v61  ;;  %v1348_v59 = vld [vmem:[#allocation2 + $0xf0] sm:$0xff] }
 0x68e   :  { %v1191_v0 = vmul.f32 %v1530_v58, %v1189_v46  ;;  %v1203_v4 = vsel %vm96_vm1, %v1202_v49, 0.0  ;;  %vm1283_vm9 = vmor %vm1281_vm8, %vm1282_vm7  ;;  %vm1197_vm10 = vweird.f32 %v1530_v58  ;;  %v1346_v49 = vld [vmem:[#allocation2 + $0xe0] sm:$0xff] }
 0x68f   :  { %v1278_v1 = vsub.f32 1.0, %v1277_v62  ;;  %v536_v5 = vsel %vm535_vm6, %v1526_v2, %v532_v63  ;;  %1204 = vadd.xlane.f32.xlu0 %v1203_v4  ;;  %vm1198_vm13 = vmor %vm1196_vm12, %vm1197_vm10  ;;  %v1347_v63 = vld [vmem:[#allocation2 + $0xe8] sm:$0xff] }
 0x690   :  { %v1192_v6 = vmul.f32 %v1530_v58, %v1191_v0  ;;  %v537_v7 = vmul.f32 %v536_v5, %v1718_v25  ;;  %v1484_v25 = vld [vmem:[%s1908_s5 + $0x4] ss:$0 sm:$0xff] }
 0x691   :  { %v1279_v8 = vmul.f32 %v1528_v61, %v1278_v1  ;;  %v709_v39 = vadd.f32 %v1484_v25, %v1740_v23 }
 0x692   :  { %v1193_v10 = vmul.f32 0.5, %v1192_v6  ;;  %v564_v11 = vmul.f32 %v537_v7, %v521_v33  ;;  %v551_v12 = vmul.f32 %v537_v7, %v505_v32 }
 0x693   :  { %v1280_v13 = vadd.f32 %v1528_v61, %v1279_v8 }
 0x694   :  { %v1194_v16 = vsub.f32 1.5, %v1193_v10  ;;  %v565_v18 = vmul.f32 %v1827_v38, %v564_v11  ;;  %v552_v19 = vmul.f32 %v1827_v38, %v551_v12 }
 0x695   :  { %v1284_v20 = vsel %vm1283_vm9, %v1528_v61, %v1280_v13 }
 0x696   :  { %v1289_v21 = vsel %vm1286_vm11, %v1288_v15, %v1284_v20  ;;  %v1195_v22 = vmul.f32 %v1530_v58, %v1194_v16  ;;  %v566_v24 = vsel %vm96_vm1, %v565_v18, 0.0  ;;  %v553_v26 = vsel %vm96_vm1, %v552_v19, 0.0 }
 0x697   :  { %v1290_v28 = vmul.f32 %v1821_v31, %v1289_v21  ;;  %v1291_v29 = vmul.f32 %v1825_v34, %v1289_v21  ;;  %v1292_v30 = vmul.f32 %v1833_v42, %v1289_v21  ;;  %567 = vadd.xlane.f32.xlu2 %v566_v24  ;;  %554 = vadd.xlane.f32.xlu1 %v553_v26 }
 0x698   :  { %v1199_v32 = vsel %vm1198_vm13, %v1530_v58, %v1195_v22  ;;  %v1596_v58 = vmov 6.0  }
 0x699   :  { %v1293_v33 = vmul.f32 %v1290_v28, %v1772_v14  ;;  %v1297_v36 = vmul.f32 %v1291_v29, %v1782_v27  ;;  %v1200_v37 = vmul.f32 %v1199_v32, %v1791_v35  ;;  %v1294_v40 = vadd.f32 1e-06, %v1290_v28 }
 0x69a   :  { %v1299_v41 = vadd.f32 1e-06, %v1291_v29  ;;  %v1305_v44 = vadd.f32 1e-06, %v1292_v30  ;;  %v1303_v31 = vmul.f32 %v1292_v30, %v1791_v35  ;;  %v711_v27 = vmax.f32 %v709_v39, 0.0 }
 0x69b   :  { %v1298_v34 = vadd.f32 %v1297_v36, %v1293_v33  ;;  %v1227_v17 = vmul.f32 %v1200_v37, %v1184_v57  ;;  %v1214_v42 = vmul.f32 %v1200_v37, %v1168_v56  ;;  %1531 = vlog2.f32 %v1294_v40  ;;  %v1491_v35 = vld [vmem:[%s1908_s5 + $0x5] ss:$0 sm:$0xff]  ;;  %v1349_v57 = vld [vmem:[#allocation2 + $0xf8] sm:$0xff] }
 0x69c   :  { %1533 = vlog2.f32 %v1299_v41  ;;  %v715_v50 = vmul.f32 %v1491_v35, %v711_v27  ;;  %1367 = vmatpush.msra.mxu1 %v1349_v57 }
 0x69d   :  { %v1304_v2 = vadd.f32 %v1303_v31, %v1298_v34  ;;  %v1228_v45 = vmul.f32 %v1827_v38, %v1227_v17  ;;  %v1215_v14 = vmul.f32 %v1827_v38, %v1214_v42  ;;  %1535 = vlog2.f32 %v1305_v44 }
 0x69e   :  { %v716_v55 = vsel %vm96_vm1, %v715_v50, 0.0  ;;  %1537 = vrcp.f32 %v1596_v58  ;;  %1368 = vmatpush.msra.mxu1 %v1348_v59 }
 0x69f   :  { %1445 = vmatmul.msk.f32.vlgmr.msra.gmra.mxu0 %vm96_vm1, %v1304_v2  ;;  %v1229_v23 = vsel %vm96_vm1, %v1228_v45, 0.0  ;;  %v1216_v46 = vsel %vm96_vm1, %v1215_v14, 0.0  ;;  %v1492_v45 = vld [vmem:[%s1908_s5 + $0x6] ss:$0 sm:$0xff]  ;;  %v1493_v14 = vld [vmem:[%s1908_s5 + $0x13] ss:$0 sm:$0xff] }
 0x6a0   :  { %1230 = vadd.xlane.f32.xlu2 %v1229_v23  ;;  %1217 = vadd.xlane.f32.xlu1 %v1216_v46 }
 0x6a1   :  { %v1532_v47 = vpop.eup %1531  ;;  %1369 = vmatpush.msra.mxu1 %v1347_v63  ;;  %v1495_v63 = vld [vmem:[%s1908_s5 + $0x15] ss:$0 sm:$0xff] }
 0x6a2   :  { %v1534_v48 = vpop.eup %1533  ;;  %v1296_v52 = vmul.f32 0.6931472, %v1532_v47 }
 0x6a3   :  { %v1536_v38 = vpop.eup %1535  ;;  %v1301_v53 = vmul.f32 0.6931472, %v1534_v48  ;;  %1370 = vmatpush.msra.mxu1 %v1346_v49 }
 0x6a4   :  { %v1307_v54 = vmul.f32 0.6931472, %v1536_v38  ;;  %v1538_v3 = vpop.eup %1537 }
 0x6a5   :  { %v1302_v43 = vadd.f32 %v1301_v53, %v1296_v52  ;;  %v578_v8 = vmul.f32 6.0, %v1538_v3  ;;  %vm582_vm14 = vweird.f32 %v1538_v3 }
 0x6a7   :  { %v1870_v56 = vadd.f32 %v1307_v54, %v1302_v43  ;;  %v579_v12 = vsub.f32 1.0, %v578_v8  ;;  %v645_v54 = vmul.f32 -0.0033333334, %v1728_v51  ;;  %v1494_v51 = vld [vmem:[%s1908_s5 + $0x14] ss:$0 sm:$0xff] }
 0x6a8   :  { %717 = vadd.xlane.f32.xlu1 %v716_v55 }
 0x6a9   :  { %v580_v20 = vmul.f32 %v1538_v3, %v579_v12  ;;  %v1309_v59 = vmul.f32 -0.0033333334, %v1870_v56  ;;  %v1496_v56 = vld [vmem:[%s1908_s5 + $0x16] ss:$0 sm:$0xff] }
 0x6ab   :  { %v581_v28 = vadd.f32 %v1538_v3, %v580_v20 }
 0x6ad   :  { %v583_v34 = vsel %vm582_vm14, %v1538_v3, %v581_v28 }
 0x6fa   :  { %v542_v60 = vpop.xlane.xlu0 %541 }
 0x6fb   :  { %v543_v61 = vrot.slane %v542_v60, 4 }
 0x6fd   :  { %v544_v62 = vadd.f32 %v543_v61, %v542_v60 }
 0x6ff   :  { %v545_v0 = vrot.slane %v544_v62, 2 }
 0x701   :  { %v546_v1 = vadd.f32 %v545_v0, %v544_v62 }
 0x702   :  { %v1205_v4 = vpop.xlane.xlu0 %1204 }
 0x703   :  { %v1206_v5 = vrot.slane %v1205_v4, 4  ;;  %v547_v6 = vrot.slane %v546_v1, 1 }
 0x705   :  { %v548_v7 = vadd.f32 %v547_v6, %v546_v1  ;;  %v1207_v9 = vadd.f32 %v1206_v5, %v1205_v4 }
 0x707   :  { %1450 = vpush %v548_v7  ;;  %v1208_v16 = vrot.slane %v1207_v9, 2 }
 0x709   :  { %v1209_v22 = vadd.f32 %v1208_v16, %v1207_v9 }
 0x70a   :  { %v555_v10 = vpop.xlane.xlu1 %554  ;;  %v568_v11 = vpop.xlane.xlu2 %567 }
 0x70b   :  { %v556_v13 = vrot.slane %v555_v10, 4  ;;  %v569_v15 = vrot.slane %v568_v11, 4  ;;  %v1210_v39 = vrot.slane %v1209_v22, 1 }
 0x70d   :  { %v557_v18 = vadd.f32 %v556_v13, %v555_v10  ;;  %v570_v19 = vadd.f32 %v569_v15, %v568_v11  ;;  %v1211_v2 = vadd.f32 %v1210_v39, %v1209_v22 }
 0x70f   :  { %v558_v25 = vrot.slane %v557_v18, 2  ;;  %v571_v21 = vrot.slane %v570_v19, 2 }
 0x711   :  { %v559_v24 = vadd.f32 %v558_v25, %v557_v18  ;;  %v572_v26 = vadd.f32 %v571_v21, %v570_v19 }
 0x713   :  { %v1218_v29 = vpop.xlane.xlu1 %1217  ;;  %v1231_v30 = vpop.xlane.xlu2 %1230  ;;  %v560_v32 = vrot.slane %v559_v24, 1  ;;  %v573_v33 = vrot.slane %v572_v26, 1 }
 0x714   :  { %v1219_v36 = vrot.slane %v1218_v29, 4  ;;  %v1232_v37 = vrot.slane %v1231_v30, 4 }
 0x715   :  { %v561_v40 = vadd.f32 %v560_v32, %v559_v24  ;;  %v574_v41 = vadd.f32 %v573_v33, %v572_v26 }
 0x716   :  { %v1220_v44 = vadd.f32 %v1219_v36, %v1218_v29  ;;  %v1233_v31 = vadd.f32 %v1232_v37, %v1231_v30 }
 0x717   :  { %1452 = vpush %v561_v40 }
 0x718   :  { %v1221_v17 = vrot.slane %v1220_v44, 2  ;;  %v1234_v42 = vrot.slane %v1233_v31, 2  ;;  %1454 = vpush %v574_v41 }
 0x719   :  { %1456 = vpush %v583_v34 }
 0x71a   :  { %1458 = vpush %v1211_v2  ;;  %v1222_v27 = vadd.f32 %v1221_v17, %v1220_v44  ;;  %v1235_v23 = vadd.f32 %v1234_v42, %v1233_v31 }
 0x71b   :  { %v718_v46 = vpop.xlane.xlu1 %717 }
 0x71c   :  { %v720_v35 = vadd.f32 %v1492_v45, %v718_v46  ;;  %v1341_v47 = vpop.f32.mrf.mxu0  ;;  %v1223_v48 = vrot.slane %v1222_v27, 1  ;;  %v1236_v50 = vrot.slane %v1235_v23, 1 }
 0x71d   :  { %v1342_v52 = vadd.f32 %v1493_v14, %v1341_v47 }
 0x71e   :  { %722 = vst.msk [vmem:[%s1909_s6] sm:$0xff] %vm721_vm15, %v720_v35  ;;  %v1224_v38 = vadd.f32 %v1223_v48, %v1222_v27  ;;  %v1237_v53 = vadd.f32 %v1236_v50, %v1235_v23 }
 0x71f   :  { %v1344_v43 = vmax.f32 %v1342_v52, 0.0 }
 0x720   :  { %1460 = vpush %v1224_v38 }
 0x721   :  { %1462 = vpush %v1237_v53  ;;  %1447 = vmatmul.msk.f32.vlgmr.msra.gmra.mxu1 %vm96_vm1, %v1344_v43 }
 0x738   :  { %s1451_s12 = spop %1450 }
 0x748   :  { %s1453_s13 = spop %1452 }
 0x749   :  { %s563_s14 = sadd.f32 %s1453_s13, %s1451_s12  ;;  %s1455_s0 = spop %1454 }
 0x74a   :  { %s1457_s16 = spop %1456 }
 0x74b   :  { %s576_s15 = sadd.f32 %s1455_s0, %s563_s14  ;;  %s1459_s20 = spop %1458 }
 0x74d   :  { %s585_s17 = smul.f32 %s1457_s16, %s576_s15 }
 0x74f   :  { %s646_s18 = sand.u32 2147483647, %s585_s17 }
 0x750   :  { %s647_s19 = smul.f32 0.01, %s646_s18 }
 0x751   :  { %s1461_s21 = spop %1460 }
 0x752   :  { %v648_v55 = vstv %s647_s19  ;;  %s1226_s22 = sadd.f32 %s1461_s21, %s1459_s20  ;;  %s1463_s23 = spop %1462 }
 0x753   :  { %v649_v57 = vadd.f32 %v648_v55, %v645_v54 }
 0x754   :  { %s1239_s24 = sadd.f32 %s1463_s23, %s1226_s22 }
 0x755   :  { %724 = vst.msk [vmem:[%s1909_s6] sm:$0xff] %vm723_vm0, %v649_v57 }
 0x756   :  { %s1248_s27 = smul.f32 %s1457_s16, %s1239_s24 }
 0x758   :  { %s1310_s28 = sand.u32 2147483647, %s1248_s27 }
 0x759   :  { %s1311_s29 = smul.f32 0.01, %s1310_s28 }
 0x75b   :  { %v1312_v60 = vstv %s1311_s29 }
 0x75c   :  { %v1313_v61 = vadd.f32 %v1312_v60, %v1309_v59 }
 0x79e   :  { %v1372_v58 = vpop.f32.mrf.mxu1 }
 0x79f   :  { %v1373_v62 = vadd.f32 %v1494_v51, %v1372_v58 }
 0x7a1   :  { %v1375_v49 = vmax.f32 %v1373_v62, 0.0 }
 0x7a3   :  { %v1379_v0 = vmul.f32 %v1495_v63, %v1375_v49 }
 0x7a5   :  { %v1380_v1 = vsel %vm96_vm1, %v1379_v0, 0.0 }
 0x7a6   :  { %1381 = vadd.xlane.f32.xlu0 %v1380_v1 }
 0x819   :  { %v1382_v3 = vpop.xlane.xlu0 %1381 }
 0x81a   :  { %v1384_v4 = vadd.f32 %v1496_v56, %v1382_v3 }
 0x81c   :  { %1386 = vrot.lane.b32.xlu2 %v1384_v4, %s1597_s9 }
 0x876   :  { %v1387_v5 = vpop.permute.xlu2 %1386 }
 0x877   :  { %1390 = vst.msk [vmem:[%s1909_s6] sm:$0xff] %vm1389_vm2, %v1387_v5 }
 0x878   :  { %1392 = vst.msk [vmem:[%s1909_s6] sm:$0xff] %vm1391_vm3, %v1313_v61 }
 0x879   :  { %1397 = vsyncpa [#allocation3], 1 }
 0x87a   :  { %1398 = vsyncpa [#allocation5], 1 }

</bundles_post_ra>
